<compile_context>
chip_gen: v7x
topology: tpu7x:2x2x1
jax: 0.10.0
libtpu: 0.0.40
codegen_flags: <defaults>
</compile_context>

<pallas_src>
import jax
import jax.numpy as jnp
from jax import lax
from jax.experimental import pallas as pl
from jax.experimental.pallas import tpu as pltpu


def self_attention_kernel(
    ids_ref,    # (T*B, 2) int32: col 0 = token id at (t, b), col 1 = id at (T-1-t, b)
    emb_ref,    # (V, E)      embedding table
    wih_ref,    # (2E, 8*H2)  input-projection block (fwd rows 0:E, bwd rows E:2E),
                #             gate-interleaved columns [i_f i_b f_f f_b g_f g_b o_f o_b]
    b_ref,      # (1, 8*H2)   combined gate biases (b_ih + b_hh), gate-interleaved
    whh_ref,    # (2*H2, 8*H2) block-diagonal recurrent weights, gate-interleaved
    w1_ref,     # (H, 24)     attention MLP layer 1
    b1_ref,     # (1, 24)
    w2_ref,     # (24, 1)     attention MLP layer 2
    b2_ref,     # (1, 1)
    wl_ref,     # (H, L)      hidden2label
    bl_ref,     # (1, L)
    y_ref,      # out: (B, L) logits
):
    B, L = y_ref.shape
    TB = ids_ref.shape[0]
    T = TB // B
    V, E = emb_ref.shape
    H = whh_ref.shape[0]          # 2 * H2 : bi-LSTM output width
    H2 = H // 2
    f32 = jnp.float32

    # ---- In-kernel embedding gather: one-hot matmuls over the (small) vocab.
    # Exact (each one-hot row selects a single table row; no rounding).
    # TODO(synk): for large vocabularies replace with a scalar-prefetch
    # pl.Element row-gather / per-row DMA instead of the one-hot matmul.
    ids = ids_ref[...]                                            # (TB, 2) int32
    viota = lax.broadcasted_iota(jnp.int32, (TB, V), 1)
    emb = emb_ref[...]
    x_f = jnp.dot((viota == ids[:, 0:1]).astype(f32), emb,
                  preferred_element_type=f32)                     # (TB, E)  x(t, b)
    x_r = jnp.dot((viota == ids[:, 1:2]).astype(f32), emb,
                  preferred_element_type=f32)                     # (TB, E)  x(T-1-t, b)

    # ---- Hoisted input projection for BOTH directions in one matmul.
    # Row t*B+b of xw holds gate-interleaved pre-activations with the fwd
    # gates driven by x(t) and the bwd gates by x(T-1-t), so each recurrence
    # step reads ONE contiguous row slice.
    x_cat = jnp.concatenate([x_f, x_r], axis=1)                   # (TB, 2E)
    xw = (jnp.dot(x_cat, wih_ref[...], preferred_element_type=f32)
          + b_ref[...])                                           # (TB, 8*H2)

    whh = whh_ref[...]        # recurrent block stays resident across the loop

    # ---- Fused fwd/bwd recurrence, fully unrolled (T static & small):
    # one 128-lane matmul + 2 full-width transcendentals per step.
    h = jnp.zeros((B, H), f32)    # [h_f | h_b]
    c = jnp.zeros((B, H), f32)    # [c_f | c_b]
    hs = []
    for t in range(T):
        gates = xw[t * B:(t + 1) * B, :] + jnp.dot(
            h, whh, preferred_element_type=f32)                   # (B, 8*H2)
        sig = jax.nn.sigmoid(gates)                               # full-vreg EUP
        th = jnp.tanh(gates)                                      # full-vreg EUP
        i_g = sig[:, 0 * H:1 * H]       # [i_f | i_b]
        f_g = sig[:, 1 * H:2 * H]       # [f_f | f_b]
        g_g = th[:, 2 * H:3 * H]        # [g_f | g_b]
        o_g = sig[:, 3 * H:4 * H]       # [o_f | o_b]
        c = f_g * c + i_g * g_g
        h = o_g * jnp.tanh(c)
        hs.append(h)

    # ---- Assemble lstm_out rows (time-major, r = t*B + b) entirely in vregs:
    # fwd half of time t comes from step t, bwd half from step T-1-t.
    hid = jnp.concatenate(
        [jnp.concatenate([hs[t][:, :H2], hs[T - 1 - t][:, H2:]], axis=1)
         for t in range(T)],
        axis=0)                                                   # (TB, H)

    # ---- Attention MLP batched over all (t, b): two matmuls, no loop.
    h1 = jnp.maximum(
        jnp.dot(hid, w1_ref[...], preferred_element_type=f32) + b1_ref[...],
        0.0)                                                      # (TB, 24)
    a = jnp.dot(h1, w2_ref[...], preferred_element_type=f32) + b2_ref[...]   # (TB, 1)

    # ---- Softmax over the sequence, per batch element.
    # Per-batch max stabilizer (rows are time-major): cheap pairwise maxima
    # over the T row blocks; guarantees denom >= 1, so the approx reciprocal
    # below cannot blow up.
    m = a[0:B, :]
    for t in range(1, T):
        m = jnp.maximum(m, a[t * B:(t + 1) * B, :])               # (B, 1)
    e = jnp.exp(a - jnp.concatenate([m] * T, axis=0))             # (TB, 1)

    # Batch-selection matrix generated in-kernel (identity tiled T times):
    # sel[b, t*B + b'] = 1.0 iff b == b'.
    eye = (lax.broadcasted_iota(jnp.int32, (B, B), 0)
           == lax.broadcasted_iota(jnp.int32, (B, B), 1)).astype(f32)
    sel = jnp.concatenate([eye] * T, axis=1)                      # (B, TB)

    # Fused softmax denominator + attention-weighted pooling: one matmul.
    eh = jnp.concatenate([e, e * hid], axis=1)                    # (TB, 1 + H)
    pooled = jnp.dot(sel, eh, preferred_element_type=f32)         # (B, 1 + H)
    feats = pooled[:, 1:] * pl.reciprocal(pooled[:, 0:1], approx=True)   # (B, H)

    # ---- hidden2label.
    y_ref[...] = (jnp.dot(feats, wl_ref[...], preferred_element_type=f32)
                  + bl_ref[...])


def prepare_params(params):
    """One-time weight fusion into the kernel layout (call at parameter-load
    time, outside the per-call jit). Gate-interleaved column order:
    [i_f i_b f_f f_b g_f g_b o_f o_b] (PyTorch gate order i, f, g, o)."""
    H2 = params["whh_f"].shape[0]
    E = params["wih_f"].shape[0]

    def interleave(wf, wb):
        parts = []
        for g in range(4):
            parts.append(wf[:, g * H2:(g + 1) * H2])
            parts.append(wb[:, g * H2:(g + 1) * H2])
        return jnp.concatenate(parts, axis=1)

    zE = jnp.zeros((E, 4 * H2), jnp.float32)
    zH = jnp.zeros((H2, 4 * H2), jnp.float32)
    fused = dict(params)
    # (2E, 8*H2): rows 0:E drive the fwd gates from x(t), rows E:2E drive the
    # bwd gates from the time-reversed x(T-1-t).
    fused["wih_blk"] = interleave(
        jnp.concatenate([params["wih_f"], zE], axis=0),
        jnp.concatenate([zE, params["wih_b"]], axis=0))
    # (2*H2, 8*H2) block-diagonal: [h_f | h_b] feeds all 8 gate blocks at once.
    fused["whh_blk"] = interleave(
        jnp.concatenate([params["whh_f"], zH], axis=0),
        jnp.concatenate([zH, params["whh_b"]], axis=0))
    fused["b_cat"] = interleave(params["b_f"], params["b_b"])      # (1, 8*H2)
    # TODO(synk): on v6e/v7x, additionally cast the MXU weight operands
    # (embeddings, wih_blk, whh_blk, w1, w_label) to bfloat16 here (keep f32
    # accumulation); keep elementwise math f32 on v5e.
    return fused


def self_attention_forward(sentence, params):
    """sentence: (B, T) int32 token ids. `params` must come from
    prepare_params(). Returns logits (B, label_size)."""
    B, T = sentence.shape
    L = params["w_label"].shape[1]

    # Time-major token ids plus their time-reversed copy: drives both the fwd
    # and bwd halves of the in-kernel embedding gather / input projection.
    ids_tm = jnp.transpose(sentence).astype(jnp.int32)             # (T, B)
    ids2 = jnp.concatenate(
        [ids_tm.reshape(T * B, 1), ids_tm[::-1].reshape(T * B, 1)], axis=1)

    vmem = pl.BlockSpec(memory_space=pltpu.MemorySpace.VMEM)
    args = (
        ids2, params["embeddings"], params["wih_blk"], params["b_cat"],
        params["whh_blk"], params["w1"], params["b1"], params["w2"],
        params["b2"], params["w_label"], params["b_label"],
    )
    # Gridless: at these shapes everything fits in VMEM/vregs. When scaling
    # B/T, add a leading "parallel" batch grid axis (second TensorCore on v7x)
    # and size per-block VMEM against v7x's 64 MiB via pltpu.CompilerParams.
    return pl.pallas_call(
        self_attention_kernel,
        out_shape=jax.ShapeDtypeStruct((B, L), jnp.float32),
        in_specs=[vmem] * len(args),
        out_specs=vmem,
    )(*args)


def init_params(key, vocab_size, embedding_dim, hidden_dim, label_size):
    H2 = hidden_dim // 2
    ks = jax.random.split(key, 12)
    scale = 0.1

    def n(k, shape):
        return jax.random.normal(k, shape, jnp.float32) * scale

    return {
        # nn.Embedding(vocab_size + 11, embedding_dim)
        "embeddings": n(ks[0], (vocab_size + 11, embedding_dim)),
        # bidirectional LSTM(embedding_dim, hidden_dim // 2) — weights stored
        # pre-transposed, biases b_ih + b_hh combined.
        "wih_f": n(ks[1], (embedding_dim, 4 * H2)),
        "whh_f": n(ks[2], (H2, 4 * H2)),
        "b_f":   n(ks[3], (1, 4 * H2)),
        "wih_b": n(ks[4], (embedding_dim, 4 * H2)),
        "whh_b": n(ks[5], (H2, 4 * H2)),
        "b_b":   n(ks[6], (1, 4 * H2)),
        # self_attention = Linear(hidden_dim, 24) -> ReLU -> Linear(24, 1)
        "w1":    n(ks[7], (hidden_dim, 24)),
        "b1":    n(ks[8], (1, 24)),
        "w2":    n(ks[9], (24, 1)),
        "b2":    n(ks[10], (1, 1)),
        # hidden2label = Linear(hidden_dim, label_size)
        "w_label": n(ks[11], (hidden_dim, label_size)),
        "b_label": jnp.zeros((1, label_size), jnp.float32),
    }


def _reference_forward(sentence, params):
    """Pure-JAX reference mirroring the PyTorch module (validation only)."""
    emb = params["embeddings"]
    x = jnp.transpose(emb[sentence].astype(jnp.float32), (1, 0, 2))   # (T, B, E)
    T, B, _ = x.shape
    H2 = params["whh_f"].shape[0]

    def run(wih, whh, b, xs):
        def step(carry, x_t):
            h, c = carry
            g = x_t @ wih + h @ whh + b[0]
            i = jax.nn.sigmoid(g[:, 0:H2])
            f = jax.nn.sigmoid(g[:, H2:2 * H2])
            gg = jnp.tanh(g[:, 2 * H2:3 * H2])
            o = jax.nn.sigmoid(g[:, 3 * H2:4 * H2])
            c = f * c + i * gg
            h = o * jnp.tanh(c)
            return (h, c), h
        z = jnp.zeros((B, H2), jnp.float32)
        _, hs = lax.scan(step, (z, z), xs)
        return hs

    h_f = run(params["wih_f"], params["whh_f"], params["b_f"], x)              # (T,B,H2)
    h_b = run(params["wih_b"], params["whh_b"], params["b_b"], x[::-1])[::-1]  # (T,B,H2)
    lstm_out = jnp.concatenate([h_f, h_b], axis=-1)                            # (T,B,H)
    a = (jnp.maximum(lstm_out @ params["w1"] + params["b1"][0], 0.0)
         @ params["w2"] + params["b2"][0])                                     # (T,B,1)
    attns = jax.nn.softmax(a[:, :, 0], axis=0)                                 # (T,B)
    feats = jnp.sum(lstm_out * attns[:, :, None], axis=0)                      # (B,H)
    return feats @ params["w_label"] + params["b_label"][0]


if __name__ == "__main__":
    key = jax.random.PRNGKey(0)
    vocab_size, embedding_dim, hidden_dim, label_size = 50, 32, 32, 4
    batch, seq = 2, 8

    pkey, skey = jax.random.split(key)
    params = init_params(pkey, vocab_size, embedding_dim, hidden_dim, label_size)
    params = prepare_params(params)   # one-time weight fusion (not per call)
    sentence = jax.random.randint(skey, (batch, seq), 0, vocab_size + 11,
                                  dtype=jnp.int32)

    y = jax.jit(self_attention_forward)(sentence, params)
    y = jax.block_until_ready(y)

    assert y.shape == (batch, label_size)
    assert bool(jnp.all(jnp.isfinite(y)))

    # Cross-check against a pure-JAX reference of the PyTorch forward.
    y_ref = _reference_forward(sentence, params)
    assert bool(jnp.allclose(y, y_ref, rtol=5e-2, atol=5e-3)), (y, y_ref)

    print("KERNEL_OK")
</pallas_src>

<mosaic_0001>
module attributes {stable_mosaic.version = 11 : i64} {
  func.func @self_attention_kernel(%arg0: memref<16x2xi32, #tpu.memory_space<vmem>>, %arg1: memref<61x32xf32, #tpu.memory_space<vmem>>, %arg2: memref<64x128xf32, #tpu.memory_space<vmem>>, %arg3: memref<1x128xf32, #tpu.memory_space<vmem>>, %arg4: memref<32x128xf32, #tpu.memory_space<vmem>>, %arg5: memref<32x24xf32, #tpu.memory_space<vmem>>, %arg6: memref<1x24xf32, #tpu.memory_space<vmem>>, %arg7: memref<24x1xf32, #tpu.memory_space<vmem>>, %arg8: memref<1x1xf32, #tpu.memory_space<vmem>>, %arg9: memref<32x4xf32, #tpu.memory_space<vmem>>, %arg10: memref<1x4xf32, #tpu.memory_space<vmem>>, %arg11: memref<2x4xf32, #tpu.memory_space<vmem>>) attributes {dimension_semantics = [], scalar_prefetch = 0 : i64, scratch_operands = 0 : i64, tpu.core_type = #tpu.core_type<tc>} {
    %c0 = arith.constant 0 : index
    %c0_0 = arith.constant 0 : index
    %0 = vector.load %arg0[%c0, %c0_0] : memref<16x2xi32, #tpu.memory_space<vmem>>, vector<16x2xi32>
    %1 = tpu.iota {dimensions = array<i32: 1>} : vector<16x61xi32>
    %c0_1 = arith.constant 0 : index
    %c0_2 = arith.constant 0 : index
    %2 = vector.load %arg1[%c0_1, %c0_2] : memref<61x32xf32, #tpu.memory_space<vmem>>, vector<61x32xf32>
    %3 = vector.extract_strided_slice %0 {offsets = [0, 0], sizes = [16, 1], strides = [1, 1]} : vector<16x2xi32> to vector<16x1xi32>
    %4 = vector.broadcast %3 : vector<16x1xi32> to vector<16x61xi32>
    %5 = arith.cmpi eq, %1, %4 : vector<16x61xi32>
    %6 = arith.extui %5 : vector<16x61xi1> to vector<16x61xi32>
    %7 = arith.sitofp %6 : vector<16x61xi32> to vector<16x61xf32>
    %cst = arith.constant dense<0.000000e+00> : vector<16x32xf32>
    %8 = tpu.matmul %7, %2, %cst {dimension_numbers = #tpu.dot_dimension_numbers<[1], [0], [0], [1], [0, 0, 1, 1], [], []>} : vector<16x61xf32>, vector<61x32xf32>, vector<16x32xf32> -> vector<16x32xf32>
    %9 = vector.extract_strided_slice %0 {offsets = [0, 1], sizes = [16, 1], strides = [1, 1]} : vector<16x2xi32> to vector<16x1xi32>
    %10 = vector.broadcast %9 : vector<16x1xi32> to vector<16x61xi32>
    %11 = arith.cmpi eq, %1, %10 : vector<16x61xi32>
    %12 = arith.extui %11 : vector<16x61xi1> to vector<16x61xi32>
    %13 = arith.sitofp %12 : vector<16x61xi32> to vector<16x61xf32>
    %cst_3 = arith.constant dense<0.000000e+00> : vector<16x32xf32>
    %14 = tpu.matmul %13, %2, %cst_3 {dimension_numbers = #tpu.dot_dimension_numbers<[1], [0], [0], [1], [0, 0, 1, 1], [], []>} : vector<16x61xf32>, vector<61x32xf32>, vector<16x32xf32> -> vector<16x32xf32>
    %15 = tpu.concatenate %8, %14 in 1 : vector<16x32xf32>, vector<16x32xf32> -> vector<16x64xf32>
    %c0_4 = arith.constant 0 : index
    %c0_5 = arith.constant 0 : index
    %16 = vector.load %arg2[%c0_4, %c0_5] : memref<64x128xf32, #tpu.memory_space<vmem>>, vector<64x128xf32>
    %cst_6 = arith.constant dense<0.000000e+00> : vector<16x128xf32>
    %17 = tpu.matmul %15, %16, %cst_6 {dimension_numbers = #tpu.dot_dimension_numbers<[1], [0], [0], [1], [0, 0, 1, 1], [], []>} : vector<16x64xf32>, vector<64x128xf32>, vector<16x128xf32> -> vector<16x128xf32>
    %c0_7 = arith.constant 0 : index
    %c0_8 = arith.constant 0 : index
    %18 = vector.load %arg3[%c0_7, %c0_8] : memref<1x128xf32, #tpu.memory_space<vmem>>, vector<1x128xf32>
    %19 = vector.broadcast %18 : vector<1x128xf32> to vector<16x128xf32>
    %20 = arith.addf %17, %19 : vector<16x128xf32>
    %c0_9 = arith.constant 0 : index
    %c0_10 = arith.constant 0 : index
    %21 = vector.load %arg4[%c0_9, %c0_10] : memref<32x128xf32, #tpu.memory_space<vmem>>, vector<32x128xf32>
    %cst_11 = arith.constant 0.000000e+00 : f32
    %22 = vector.broadcast %cst_11 : f32 to vector<2x32xf32>
    %cst_12 = arith.constant 0.000000e+00 : f32
    %23 = vector.broadcast %cst_12 : f32 to vector<2x32xf32>
    %24 = vector.extract_strided_slice %20 {offsets = [0, 0], sizes = [2, 128], strides = [1, 1]} : vector<16x128xf32> to vector<2x128xf32>
    %cst_13 = arith.constant dense<0.000000e+00> : vector<2x128xf32>
    %25 = tpu.matmul %22, %21, %cst_13 {dimension_numbers = #tpu.dot_dimension_numbers<[1], [0], [0], [1], [0, 0, 1, 1], [], []>} : vector<2x32xf32>, vector<32x128xf32>, vector<2x128xf32> -> vector<2x128xf32>
    %26 = arith.addf %24, %25 : vector<2x128xf32>
    %27 = arith.negf %26 : vector<2x128xf32>
    %28 = math.exp %27 : vector<2x128xf32>
    %cst_14 = arith.constant 1.000000e+00 : f32
    %29 = vector.broadcast %cst_14 : f32 to vector<2x128xf32>
    %30 = arith.addf %29, %28 : vector<2x128xf32>
    %31 = arith.divf %29, %30 : vector<2x128xf32>
    %32 = math.tanh %26 : vector<2x128xf32>
    %33 = vector.extract_strided_slice %31 {offsets = [0, 0], sizes = [2, 32], strides = [1, 1]} : vector<2x128xf32> to vector<2x32xf32>
    %34 = vector.extract_strided_slice %31 {offsets = [0, 32], sizes = [2, 32], strides = [1, 1]} : vector<2x128xf32> to vector<2x32xf32>
    %35 = vector.extract_strided_slice %32 {offsets = [0, 64], sizes = [2, 32], strides = [1, 1]} : vector<2x128xf32> to vector<2x32xf32>
    %36 = vector.extract_strided_slice %31 {offsets = [0, 96], sizes = [2, 32], strides = [1, 1]} : vector<2x128xf32> to vector<2x32xf32>
    %37 = arith.mulf %34, %23 : vector<2x32xf32>
    %38 = arith.mulf %33, %35 : vector<2x32xf32>
    %39 = arith.addf %37, %38 : vector<2x32xf32>
    %40 = math.tanh %39 : vector<2x32xf32>
    %41 = arith.mulf %36, %40 : vector<2x32xf32>
    %42 = vector.extract_strided_slice %20 {offsets = [2, 0], sizes = [2, 128], strides = [1, 1]} : vector<16x128xf32> to vector<2x128xf32>
    %cst_15 = arith.constant dense<0.000000e+00> : vector<2x128xf32>
    %43 = tpu.matmul %41, %21, %cst_15 {dimension_numbers = #tpu.dot_dimension_numbers<[1], [0], [0], [1], [0, 0, 1, 1], [], []>} : vector<2x32xf32>, vector<32x128xf32>, vector<2x128xf32> -> vector<2x128xf32>
    %44 = arith.addf %42, %43 : vector<2x128xf32>
    %45 = arith.negf %44 : vector<2x128xf32>
    %46 = math.exp %45 : vector<2x128xf32>
    %cst_16 = arith.constant 1.000000e+00 : f32
    %47 = vector.broadcast %cst_16 : f32 to vector<2x128xf32>
    %48 = arith.addf %47, %46 : vector<2x128xf32>
    %49 = arith.divf %47, %48 : vector<2x128xf32>
    %50 = math.tanh %44 : vector<2x128xf32>
    %51 = vector.extract_strided_slice %49 {offsets = [0, 0], sizes = [2, 32], strides = [1, 1]} : vector<2x128xf32> to vector<2x32xf32>
    %52 = vector.extract_strided_slice %49 {offsets = [0, 32], sizes = [2, 32], strides = [1, 1]} : vector<2x128xf32> to vector<2x32xf32>
    %53 = vector.extract_strided_slice %50 {offsets = [0, 64], sizes = [2, 32], strides = [1, 1]} : vector<2x128xf32> to vector<2x32xf32>
    %54 = vector.extract_strided_slice %49 {offsets = [0, 96], sizes = [2, 32], strides = [1, 1]} : vector<2x128xf32> to vector<2x32xf32>
    %55 = arith.mulf %52, %39 : vector<2x32xf32>
    %56 = arith.mulf %51, %53 : vector<2x32xf32>
    %57 = arith.addf %55, %56 : vector<2x32xf32>
    %58 = math.tanh %57 : vector<2x32xf32>
    %59 = arith.mulf %54, %58 : vector<2x32xf32>
    %60 = vector.extract_strided_slice %20 {offsets = [4, 0], sizes = [2, 128], strides = [1, 1]} : vector<16x128xf32> to vector<2x128xf32>
    %cst_17 = arith.constant dense<0.000000e+00> : vector<2x128xf32>
    %61 = tpu.matmul %59, %21, %cst_17 {dimension_numbers = #tpu.dot_dimension_numbers<[1], [0], [0], [1], [0, 0, 1, 1], [], []>} : vector<2x32xf32>, vector<32x128xf32>, vector<2x128xf32> -> vector<2x128xf32>
    %62 = arith.addf %60, %61 : vector<2x128xf32>
    %63 = arith.negf %62 : vector<2x128xf32>
    %64 = math.exp %63 : vector<2x128xf32>
    %cst_18 = arith.constant 1.000000e+00 : f32
    %65 = vector.broadcast %cst_18 : f32 to vector<2x128xf32>
    %66 = arith.addf %65, %64 : vector<2x128xf32>
    %67 = arith.divf %65, %66 : vector<2x128xf32>
    %68 = math.tanh %62 : vector<2x128xf32>
    %69 = vector.extract_strided_slice %67 {offsets = [0, 0], sizes = [2, 32], strides = [1, 1]} : vector<2x128xf32> to vector<2x32xf32>
    %70 = vector.extract_strided_slice %67 {offsets = [0, 32], sizes = [2, 32], strides = [1, 1]} : vector<2x128xf32> to vector<2x32xf32>
    %71 = vector.extract_strided_slice %68 {offsets = [0, 64], sizes = [2, 32], strides = [1, 1]} : vector<2x128xf32> to vector<2x32xf32>
    %72 = vector.extract_strided_slice %67 {offsets = [0, 96], sizes = [2, 32], strides = [1, 1]} : vector<2x128xf32> to vector<2x32xf32>
    %73 = arith.mulf %70, %57 : vector<2x32xf32>
    %74 = arith.mulf %69, %71 : vector<2x32xf32>
    %75 = arith.addf %73, %74 : vector<2x32xf32>
    %76 = math.tanh %75 : vector<2x32xf32>
    %77 = arith.mulf %72, %76 : vector<2x32xf32>
    %78 = vector.extract_strided_slice %20 {offsets = [6, 0], sizes = [2, 128], strides = [1, 1]} : vector<16x128xf32> to vector<2x128xf32>
    %cst_19 = arith.constant dense<0.000000e+00> : vector<2x128xf32>
    %79 = tpu.matmul %77, %21, %cst_19 {dimension_numbers = #tpu.dot_dimension_numbers<[1], [0], [0], [1], [0, 0, 1, 1], [], []>} : vector<2x32xf32>, vector<32x128xf32>, vector<2x128xf32> -> vector<2x128xf32>
    %80 = arith.addf %78, %79 : vector<2x128xf32>
    %81 = arith.negf %80 : vector<2x128xf32>
    %82 = math.exp %81 : vector<2x128xf32>
    %cst_20 = arith.constant 1.000000e+00 : f32
    %83 = vector.broadcast %cst_20 : f32 to vector<2x128xf32>
    %84 = arith.addf %83, %82 : vector<2x128xf32>
    %85 = arith.divf %83, %84 : vector<2x128xf32>
    %86 = math.tanh %80 : vector<2x128xf32>
    %87 = vector.extract_strided_slice %85 {offsets = [0, 0], sizes = [2, 32], strides = [1, 1]} : vector<2x128xf32> to vector<2x32xf32>
    %88 = vector.extract_strided_slice %85 {offsets = [0, 32], sizes = [2, 32], strides = [1, 1]} : vector<2x128xf32> to vector<2x32xf32>
    %89 = vector.extract_strided_slice %86 {offsets = [0, 64], sizes = [2, 32], strides = [1, 1]} : vector<2x128xf32> to vector<2x32xf32>
    %90 = vector.extract_strided_slice %85 {offsets = [0, 96], sizes = [2, 32], strides = [1, 1]} : vector<2x128xf32> to vector<2x32xf32>
    %91 = arith.mulf %88, %75 : vector<2x32xf32>
    %92 = arith.mulf %87, %89 : vector<2x32xf32>
    %93 = arith.addf %91, %92 : vector<2x32xf32>
    %94 = math.tanh %93 : vector<2x32xf32>
    %95 = arith.mulf %90, %94 : vector<2x32xf32>
    %96 = vector.extract_strided_slice %20 {offsets = [8, 0], sizes = [2, 128], strides = [1, 1]} : vector<16x128xf32> to vector<2x128xf32>
    %cst_21 = arith.constant dense<0.000000e+00> : vector<2x128xf32>
    %97 = tpu.matmul %95, %21, %cst_21 {dimension_numbers = #tpu.dot_dimension_numbers<[1], [0], [0], [1], [0, 0, 1, 1], [], []>} : vector<2x32xf32>, vector<32x128xf32>, vector<2x128xf32> -> vector<2x128xf32>
    %98 = arith.addf %96, %97 : vector<2x128xf32>
    %99 = arith.negf %98 : vector<2x128xf32>
    %100 = math.exp %99 : vector<2x128xf32>
    %cst_22 = arith.constant 1.000000e+00 : f32
    %101 = vector.broadcast %cst_22 : f32 to vector<2x128xf32>
    %102 = arith.addf %101, %100 : vector<2x128xf32>
    %103 = arith.divf %101, %102 : vector<2x128xf32>
    %104 = math.tanh %98 : vector<2x128xf32>
    %105 = vector.extract_strided_slice %103 {offsets = [0, 0], sizes = [2, 32], strides = [1, 1]} : vector<2x128xf32> to vector<2x32xf32>
    %106 = vector.extract_strided_slice %103 {offsets = [0, 32], sizes = [2, 32], strides = [1, 1]} : vector<2x128xf32> to vector<2x32xf32>
    %107 = vector.extract_strided_slice %104 {offsets = [0, 64], sizes = [2, 32], strides = [1, 1]} : vector<2x128xf32> to vector<2x32xf32>
    %108 = vector.extract_strided_slice %103 {offsets = [0, 96], sizes = [2, 32], strides = [1, 1]} : vector<2x128xf32> to vector<2x32xf32>
    %109 = arith.mulf %106, %93 : vector<2x32xf32>
    %110 = arith.mulf %105, %107 : vector<2x32xf32>
    %111 = arith.addf %109, %110 : vector<2x32xf32>
    %112 = math.tanh %111 : vector<2x32xf32>
    %113 = arith.mulf %108, %112 : vector<2x32xf32>
    %114 = vector.extract_strided_slice %20 {offsets = [10, 0], sizes = [2, 128], strides = [1, 1]} : vector<16x128xf32> to vector<2x128xf32>
    %cst_23 = arith.constant dense<0.000000e+00> : vector<2x128xf32>
    %115 = tpu.matmul %113, %21, %cst_23 {dimension_numbers = #tpu.dot_dimension_numbers<[1], [0], [0], [1], [0, 0, 1, 1], [], []>} : vector<2x32xf32>, vector<32x128xf32>, vector<2x128xf32> -> vector<2x128xf32>
    %116 = arith.addf %114, %115 : vector<2x128xf32>
    %117 = arith.negf %116 : vector<2x128xf32>
    %118 = math.exp %117 : vector<2x128xf32>
    %cst_24 = arith.constant 1.000000e+00 : f32
    %119 = vector.broadcast %cst_24 : f32 to vector<2x128xf32>
    %120 = arith.addf %119, %118 : vector<2x128xf32>
    %121 = arith.divf %119, %120 : vector<2x128xf32>
    %122 = math.tanh %116 : vector<2x128xf32>
    %123 = vector.extract_strided_slice %121 {offsets = [0, 0], sizes = [2, 32], strides = [1, 1]} : vector<2x128xf32> to vector<2x32xf32>
    %124 = vector.extract_strided_slice %121 {offsets = [0, 32], sizes = [2, 32], strides = [1, 1]} : vector<2x128xf32> to vector<2x32xf32>
    %125 = vector.extract_strided_slice %122 {offsets = [0, 64], sizes = [2, 32], strides = [1, 1]} : vector<2x128xf32> to vector<2x32xf32>
    %126 = vector.extract_strided_slice %121 {offsets = [0, 96], sizes = [2, 32], strides = [1, 1]} : vector<2x128xf32> to vector<2x32xf32>
    %127 = arith.mulf %124, %111 : vector<2x32xf32>
    %128 = arith.mulf %123, %125 : vector<2x32xf32>
    %129 = arith.addf %127, %128 : vector<2x32xf32>
    %130 = math.tanh %129 : vector<2x32xf32>
    %131 = arith.mulf %126, %130 : vector<2x32xf32>
    %132 = vector.extract_strided_slice %20 {offsets = [12, 0], sizes = [2, 128], strides = [1, 1]} : vector<16x128xf32> to vector<2x128xf32>
    %cst_25 = arith.constant dense<0.000000e+00> : vector<2x128xf32>
    %133 = tpu.matmul %131, %21, %cst_25 {dimension_numbers = #tpu.dot_dimension_numbers<[1], [0], [0], [1], [0, 0, 1, 1], [], []>} : vector<2x32xf32>, vector<32x128xf32>, vector<2x128xf32> -> vector<2x128xf32>
    %134 = arith.addf %132, %133 : vector<2x128xf32>
    %135 = arith.negf %134 : vector<2x128xf32>
    %136 = math.exp %135 : vector<2x128xf32>
    %cst_26 = arith.constant 1.000000e+00 : f32
    %137 = vector.broadcast %cst_26 : f32 to vector<2x128xf32>
    %138 = arith.addf %137, %136 : vector<2x128xf32>
    %139 = arith.divf %137, %138 : vector<2x128xf32>
    %140 = math.tanh %134 : vector<2x128xf32>
    %141 = vector.extract_strided_slice %139 {offsets = [0, 0], sizes = [2, 32], strides = [1, 1]} : vector<2x128xf32> to vector<2x32xf32>
    %142 = vector.extract_strided_slice %139 {offsets = [0, 32], sizes = [2, 32], strides = [1, 1]} : vector<2x128xf32> to vector<2x32xf32>
    %143 = vector.extract_strided_slice %140 {offsets = [0, 64], sizes = [2, 32], strides = [1, 1]} : vector<2x128xf32> to vector<2x32xf32>
    %144 = vector.extract_strided_slice %139 {offsets = [0, 96], sizes = [2, 32], strides = [1, 1]} : vector<2x128xf32> to vector<2x32xf32>
    %145 = arith.mulf %142, %129 : vector<2x32xf32>
    %146 = arith.mulf %141, %143 : vector<2x32xf32>
    %147 = arith.addf %145, %146 : vector<2x32xf32>
    %148 = math.tanh %147 : vector<2x32xf32>
    %149 = arith.mulf %144, %148 : vector<2x32xf32>
    %150 = vector.extract_strided_slice %20 {offsets = [14, 0], sizes = [2, 128], strides = [1, 1]} : vector<16x128xf32> to vector<2x128xf32>
    %cst_27 = arith.constant dense<0.000000e+00> : vector<2x128xf32>
    %151 = tpu.matmul %149, %21, %cst_27 {dimension_numbers = #tpu.dot_dimension_numbers<[1], [0], [0], [1], [0, 0, 1, 1], [], []>} : vector<2x32xf32>, vector<32x128xf32>, vector<2x128xf32> -> vector<2x128xf32>
    %152 = arith.addf %150, %151 : vector<2x128xf32>
    %153 = arith.negf %152 : vector<2x128xf32>
    %154 = math.exp %153 : vector<2x128xf32>
    %cst_28 = arith.constant 1.000000e+00 : f32
    %155 = vector.broadcast %cst_28 : f32 to vector<2x128xf32>
    %156 = arith.addf %155, %154 : vector<2x128xf32>
    %157 = arith.divf %155, %156 : vector<2x128xf32>
    %158 = math.tanh %152 : vector<2x128xf32>
    %159 = vector.extract_strided_slice %157 {offsets = [0, 0], sizes = [2, 32], strides = [1, 1]} : vector<2x128xf32> to vector<2x32xf32>
    %160 = vector.extract_strided_slice %157 {offsets = [0, 32], sizes = [2, 32], strides = [1, 1]} : vector<2x128xf32> to vector<2x32xf32>
    %161 = vector.extract_strided_slice %158 {offsets = [0, 64], sizes = [2, 32], strides = [1, 1]} : vector<2x128xf32> to vector<2x32xf32>
    %162 = vector.extract_strided_slice %157 {offsets = [0, 96], sizes = [2, 32], strides = [1, 1]} : vector<2x128xf32> to vector<2x32xf32>
    %163 = arith.mulf %160, %147 : vector<2x32xf32>
    %164 = arith.mulf %159, %161 : vector<2x32xf32>
    %165 = arith.addf %163, %164 : vector<2x32xf32>
    %166 = math.tanh %165 : vector<2x32xf32>
    %167 = arith.mulf %162, %166 : vector<2x32xf32>
    %168 = vector.extract_strided_slice %41 {offsets = [0, 0], sizes = [2, 16], strides = [1, 1]} : vector<2x32xf32> to vector<2x16xf32>
    %169 = vector.extract_strided_slice %167 {offsets = [0, 16], sizes = [2, 16], strides = [1, 1]} : vector<2x32xf32> to vector<2x16xf32>
    %170 = tpu.concatenate %168, %169 in 1 : vector<2x16xf32>, vector<2x16xf32> -> vector<2x32xf32>
    %171 = vector.extract_strided_slice %59 {offsets = [0, 0], sizes = [2, 16], strides = [1, 1]} : vector<2x32xf32> to vector<2x16xf32>
    %172 = vector.extract_strided_slice %149 {offsets = [0, 16], sizes = [2, 16], strides = [1, 1]} : vector<2x32xf32> to vector<2x16xf32>
    %173 = tpu.concatenate %171, %172 in 1 : vector<2x16xf32>, vector<2x16xf32> -> vector<2x32xf32>
    %174 = vector.extract_strided_slice %77 {offsets = [0, 0], sizes = [2, 16], strides = [1, 1]} : vector<2x32xf32> to vector<2x16xf32>
    %175 = vector.extract_strided_slice %131 {offsets = [0, 16], sizes = [2, 16], strides = [1, 1]} : vector<2x32xf32> to vector<2x16xf32>
    %176 = tpu.concatenate %174, %175 in 1 : vector<2x16xf32>, vector<2x16xf32> -> vector<2x32xf32>
    %177 = vector.extract_strided_slice %95 {offsets = [0, 0], sizes = [2, 16], strides = [1, 1]} : vector<2x32xf32> to vector<2x16xf32>
    %178 = vector.extract_strided_slice %113 {offsets = [0, 16], sizes = [2, 16], strides = [1, 1]} : vector<2x32xf32> to vector<2x16xf32>
    %179 = tpu.concatenate %177, %178 in 1 : vector<2x16xf32>, vector<2x16xf32> -> vector<2x32xf32>
    %180 = vector.extract_strided_slice %113 {offsets = [0, 0], sizes = [2, 16], strides = [1, 1]} : vector<2x32xf32> to vector<2x16xf32>
    %181 = vector.extract_strided_slice %95 {offsets = [0, 16], sizes = [2, 16], strides = [1, 1]} : vector<2x32xf32> to vector<2x16xf32>
    %182 = tpu.concatenate %180, %181 in 1 : vector<2x16xf32>, vector<2x16xf32> -> vector<2x32xf32>
    %183 = vector.extract_strided_slice %131 {offsets = [0, 0], sizes = [2, 16], strides = [1, 1]} : vector<2x32xf32> to vector<2x16xf32>
    %184 = vector.extract_strided_slice %77 {offsets = [0, 16], sizes = [2, 16], strides = [1, 1]} : vector<2x32xf32> to vector<2x16xf32>
    %185 = tpu.concatenate %183, %184 in 1 : vector<2x16xf32>, vector<2x16xf32> -> vector<2x32xf32>
    %186 = vector.extract_strided_slice %149 {offsets = [0, 0], sizes = [2, 16], strides = [1, 1]} : vector<2x32xf32> to vector<2x16xf32>
    %187 = vector.extract_strided_slice %59 {offsets = [0, 16], sizes = [2, 16], strides = [1, 1]} : vector<2x32xf32> to vector<2x16xf32>
    %188 = tpu.concatenate %186, %187 in 1 : vector<2x16xf32>, vector<2x16xf32> -> vector<2x32xf32>
    %189 = vector.extract_strided_slice %167 {offsets = [0, 0], sizes = [2, 16], strides = [1, 1]} : vector<2x32xf32> to vector<2x16xf32>
    %190 = vector.extract_strided_slice %41 {offsets = [0, 16], sizes = [2, 16], strides = [1, 1]} : vector<2x32xf32> to vector<2x16xf32>
    %191 = tpu.concatenate %189, %190 in 1 : vector<2x16xf32>, vector<2x16xf32> -> vector<2x32xf32>
    %192 = tpu.concatenate %170, %173, %176, %179, %182, %185, %188, %191 in 0 : vector<2x32xf32>, vector<2x32xf32>, vector<2x32xf32>, vector<2x32xf32>, vector<2x32xf32>, vector<2x32xf32>, vector<2x32xf32>, vector<2x32xf32> -> vector<16x32xf32>
    %c0_29 = arith.constant 0 : index
    %c0_30 = arith.constant 0 : index
    %193 = vector.load %arg5[%c0_29, %c0_30] : memref<32x24xf32, #tpu.memory_space<vmem>>, vector<32x24xf32>
    %cst_31 = arith.constant dense<0.000000e+00> : vector<16x24xf32>
    %194 = tpu.matmul %192, %193, %cst_31 {dimension_numbers = #tpu.dot_dimension_numbers<[1], [0], [0], [1], [0, 0, 1, 1], [], []>} : vector<16x32xf32>, vector<32x24xf32>, vector<16x24xf32> -> vector<16x24xf32>
    %c0_32 = arith.constant 0 : index
    %c0_33 = arith.constant 0 : index
    %195 = vector.load %arg6[%c0_32, %c0_33] : memref<1x24xf32, #tpu.memory_space<vmem>>, vector<1x24xf32>
    %196 = vector.broadcast %195 : vector<1x24xf32> to vector<16x24xf32>
    %197 = arith.addf %194, %196 : vector<16x24xf32>
    %cst_34 = arith.constant 0.000000e+00 : f32
    %198 = vector.broadcast %cst_34 : f32 to vector<16x24xf32>
    %199 = arith.maximumf %197, %198 : vector<16x24xf32>
    %c0_35 = arith.constant 0 : index
    %c0_36 = arith.constant 0 : index
    %200 = vector.load %arg7[%c0_35, %c0_36] : memref<24x1xf32, #tpu.memory_space<vmem>>, vector<24x1xf32>
    %cst_37 = arith.constant dense<0.000000e+00> : vector<16x1xf32>
    %201 = tpu.matmul %199, %200, %cst_37 {dimension_numbers = #tpu.dot_dimension_numbers<[1], [0], [0], [1], [0, 0, 1, 1], [], []>} : vector<16x24xf32>, vector<24x1xf32>, vector<16x1xf32> -> vector<16x1xf32>
    %c0_38 = arith.constant 0 : index
    %c0_39 = arith.constant 0 : index
    %202 = vector.load %arg8[%c0_38, %c0_39] : memref<1x1xf32, #tpu.memory_space<vmem>>, vector<1x1xf32>
    %203 = vector.broadcast %202 : vector<1x1xf32> to vector<16x1xf32>
    %204 = arith.addf %201, %203 : vector<16x1xf32>
    %205 = vector.extract_strided_slice %204 {offsets = [0, 0], sizes = [2, 1], strides = [1, 1]} : vector<16x1xf32> to vector<2x1xf32>
    %206 = vector.extract_strided_slice %204 {offsets = [2, 0], sizes = [2, 1], strides = [1, 1]} : vector<16x1xf32> to vector<2x1xf32>
    %207 = arith.maximumf %205, %206 : vector<2x1xf32>
    %208 = vector.extract_strided_slice %204 {offsets = [4, 0], sizes = [2, 1], strides = [1, 1]} : vector<16x1xf32> to vector<2x1xf32>
    %209 = arith.maximumf %207, %208 : vector<2x1xf32>
    %210 = vector.extract_strided_slice %204 {offsets = [6, 0], sizes = [2, 1], strides = [1, 1]} : vector<16x1xf32> to vector<2x1xf32>
    %211 = arith.maximumf %209, %210 : vector<2x1xf32>
    %212 = vector.extract_strided_slice %204 {offsets = [8, 0], sizes = [2, 1], strides = [1, 1]} : vector<16x1xf32> to vector<2x1xf32>
    %213 = arith.maximumf %211, %212 : vector<2x1xf32>
    %214 = vector.extract_strided_slice %204 {offsets = [10, 0], sizes = [2, 1], strides = [1, 1]} : vector<16x1xf32> to vector<2x1xf32>
    %215 = arith.maximumf %213, %214 : vector<2x1xf32>
    %216 = vector.extract_strided_slice %204 {offsets = [12, 0], sizes = [2, 1], strides = [1, 1]} : vector<16x1xf32> to vector<2x1xf32>
    %217 = arith.maximumf %215, %216 : vector<2x1xf32>
    %218 = vector.extract_strided_slice %204 {offsets = [14, 0], sizes = [2, 1], strides = [1, 1]} : vector<16x1xf32> to vector<2x1xf32>
    %219 = arith.maximumf %217, %218 : vector<2x1xf32>
    %220 = tpu.concatenate %219, %219, %219, %219, %219, %219, %219, %219 in 0 : vector<2x1xf32>, vector<2x1xf32>, vector<2x1xf32>, vector<2x1xf32>, vector<2x1xf32>, vector<2x1xf32>, vector<2x1xf32>, vector<2x1xf32> -> vector<16x1xf32>
    %221 = arith.subf %204, %220 : vector<16x1xf32>
    %222 = math.exp %221 : vector<16x1xf32>
    %223 = tpu.iota {dimensions = array<i32: 0>} : vector<2x2xi32>
    %224 = tpu.iota {dimensions = array<i32: 1>} : vector<2x2xi32>
    %225 = arith.cmpi eq, %223, %224 : vector<2x2xi32>
    %226 = arith.extui %225 : vector<2x2xi1> to vector<2x2xi32>
    %227 = arith.sitofp %226 : vector<2x2xi32> to vector<2x2xf32>
    %228 = tpu.concatenate %227, %227, %227, %227, %227, %227, %227, %227 in 1 : vector<2x2xf32>, vector<2x2xf32>, vector<2x2xf32>, vector<2x2xf32>, vector<2x2xf32>, vector<2x2xf32>, vector<2x2xf32>, vector<2x2xf32> -> vector<2x16xf32>
    %229 = vector.broadcast %222 : vector<16x1xf32> to vector<16x32xf32>
    %230 = arith.mulf %229, %192 : vector<16x32xf32>
    %231 = tpu.concatenate %222, %230 in 1 : vector<16x1xf32>, vector<16x32xf32> -> vector<16x33xf32>
    %cst_40 = arith.constant dense<0.000000e+00> : vector<2x33xf32>
    %232 = tpu.matmul %228, %231, %cst_40 {dimension_numbers = #tpu.dot_dimension_numbers<[1], [0], [0], [1], [0, 0, 1, 1], [], []>} : vector<2x16xf32>, vector<16x33xf32>, vector<2x33xf32> -> vector<2x33xf32>
    %233 = vector.extract_strided_slice %232 {offsets = [0, 1], sizes = [2, 32], strides = [1, 1]} : vector<2x33xf32> to vector<2x32xf32>
    %234 = vector.extract_strided_slice %232 {offsets = [0, 0], sizes = [2, 1], strides = [1, 1]} : vector<2x33xf32> to vector<2x1xf32>
    %235 = tpu.reciprocal %234 {approx = true} : vector<2x1xf32> -> vector<2x1xf32>
    %236 = vector.broadcast %235 : vector<2x1xf32> to vector<2x32xf32>
    %237 = arith.mulf %233, %236 : vector<2x32xf32>
    %c0_41 = arith.constant 0 : index
    %c0_42 = arith.constant 0 : index
    %238 = vector.load %arg9[%c0_41, %c0_42] : memref<32x4xf32, #tpu.memory_space<vmem>>, vector<32x4xf32>
    %cst_43 = arith.constant dense<0.000000e+00> : vector<2x4xf32>
    %239 = tpu.matmul %237, %238, %cst_43 {dimension_numbers = #tpu.dot_dimension_numbers<[1], [0], [0], [1], [0, 0, 1, 1], [], []>} : vector<2x32xf32>, vector<32x4xf32>, vector<2x4xf32> -> vector<2x4xf32>
    %c0_44 = arith.constant 0 : index
    %c0_45 = arith.constant 0 : index
    %240 = vector.load %arg10[%c0_44, %c0_45] : memref<1x4xf32, #tpu.memory_space<vmem>>, vector<1x4xf32>
    %241 = vector.broadcast %240 : vector<1x4xf32> to vector<2x4xf32>
    %242 = arith.addf %239, %241 : vector<2x4xf32>
    %c0_46 = arith.constant 0 : index
    %c0_47 = arith.constant 0 : index
    %243 = vector.load %arg11[%c0_46, %c0_47] : memref<2x4xf32, #tpu.memory_space<vmem>>, vector<2x4xf32>
    tpu.vector_store %arg11[%c0_46, %c0_47], %242 {strides = array<i32>} : memref<2x4xf32, #tpu.memory_space<vmem>>, vector<2x4xf32>,
    return
  }
}

</mosaic_0001>

<bundles_post_ra>
// kernel: self_attention_forward.1
= control target key start
LH: loop header
LB: loop body
LE: loop exit
PB: predicated region body
PF: predicated region fallthrough
CT: control target
= control target key end

     0   :  { %s2700_s0 = inlined_call_operand.vmem [shape: s32[16,2], index: 0, kind: input, shape index: {}]   ;;  %s2701_s1 = inlined_call_operand.vmem [shape: f32[61,32], index: 1, kind: input, shape index: {}]   ;;  %s2702_s2 = inlined_call_operand.vmem [shape: f32[64,128], index: 2, kind: input, shape index: {}]   ;;  %s2703_s3 = inlined_call_operand.vmem [shape: f32[1,128], index: 3, kind: input, shape index: {}]   ;;  %s2704_s4 = inlined_call_operand.vmem [shape: f32[32,128], index: 4, kind: input, shape index: {}]   ;;  %s2705_s5 = inlined_call_operand.vmem [shape: f32[32,24], index: 5, kind: input, shape index: {}]   ;;  %s2706_s6 = inlined_call_operand.vmem [shape: f32[1,24], index: 6, kind: input, shape index: {}]   ;;  %s2707_s7 = inlined_call_operand.vmem [shape: f32[24,1], index: 7, kind: input, shape index: {}]   ;;  %s2708_s8 = inlined_call_operand.<no memory space> [shape: f32[1,1], index: 8, kind: input, shape index: {}]   ;;  %s2709_s9 = inlined_call_operand.vmem [shape: f32[32,4], index: 9, kind: input, shape index: {}]   ;;  %s2710_s10 = inlined_call_operand.vmem [shape: f32[1,4], index: 10, kind: input, shape index: {}]   ;;  %s2711_s11 = inlined_call_operand.hbm [shape: f32[2,4], index: 11, kind: output, shape index: {}]  }
   0x1   :  { %v16_v0 = vstv %s2708_s8 }
   0x2   :  { %17 = vst [vmem:[#allocation2] sm:$0x1] %v16_v0 }
   0x3   :  { %v41_v1 = vld [vmem:[%s2700_s0] sm:$0xff]  ;;  %v2286_v3 = vmov 1   ;;  %v2287_v4 = vmov 0   ;;  %v46_v5 = vld [vmem:[%s2701_s1 + $0x8] sm:$0xff]  ;;  %v47_v6 = vld [vmem:[%s2701_s1 + $0x10] sm:$0xff] }
   0x4   :  { %v45_v2 = vld [vmem:[%s2701_s1] sm:$0xff]  ;;  %2184 = vset.pattern.permute.xlu0 %v2286_v3  ;;  %2185 = vset.pattern.permute.xlu1 %v2287_v4  ;;  %v48_v7 = vld [vmem:[%s2701_s1 + $0x18] sm:$0xff]  ;;  %v42_v9 = vld [vmem:[%s2700_s0 + $0x8] sm:$0xff] }
   0x5   :  { %152 = vperm.xlu0 %2184, %v41_v1   ;;  %54 = vperm.xlu1 %2185, %v41_v1   ;;  %v2045_v8 = vpack.c.bf16 %v46_v5, %v45_v2  ;;  %v2049_v10 = vpack.c.bf16 %v48_v7, %v47_v6  ;;  %v49_v11 = vld [vmem:[%s2701_s1 + $0x20] sm:$0xff]  ;;  %v50_v12 = vld [vmem:[%s2701_s1 + $0x28] sm:$0xff] }
   0x7   :  { %2064 = vmatprep.subr.bf16.mxu1 %v2045_v8  ;;  %2046 = vmatprep.subr.bf16.mxu0 %v2045_v8 }
   0x8   :  { %2066 = vmatpush3.bf16.msra.mxu1 %v2045_v8  ;;  %2048 = vmatpush3.bf16.msra.mxu0 %v2045_v8 }
   0x9   :  { %18 = vsyncpa [#allocation4], 0  ;;  %155 = vperm.xlu0 %2184, %v42_v9   ;;  %57 = vperm.xlu1 %2185, %v42_v9   ;;  %v2053_v13 = vpack.c.bf16 %v50_v12, %v49_v11  ;;  %v51_v14 = vld [vmem:[%s2701_s1 + $0x30] sm:$0xff]  ;;  %v52_v15 = vld [vmem:[%s2701_s1 + $0x38] sm:$0x1f]  ;;  %vm72_vm0 = vcmask 1044480   ;;  %v43_v17 = vlaneseq }
   0xa   :  { %2068 = vmatprep.subr.bf16.mxu1 %v2049_v10  ;;  %2050 = vmatprep.subr.bf16.mxu0 %v2049_v10  ;;  %v2057_v16 = vpack.c.bf16 %v52_v15, %v51_v14  ;;  %vm2288_vm1 = vmmov 1   ;;  %vm65_vm3 = vcmask 498688   ;;  %v2289_v21 = vmov 0.0   ;;  %v255_v28 = vld [vmem:[%s2702_s2] sm:$0xff]  ;;  %v256_v29 = vld [vmem:[%s2702_s2 + $0x8] sm:$0xff]  ;;  %v257_v30 = vld [vmem:[%s2702_s2 + $0x10] sm:$0xff] }
   0xb   :  { %vm2058_vm2 = vmpackc.low %vm72_vm0, %vm2288_vm1  ;;  %v2398_v18 = vand.u32 127, %v43_v17  ;;  %v2081_v31 = vpack.c.bf16 %v256_v29, %v255_v28  ;;  %v258_v32 = vld [vmem:[%s2702_s2 + $0x18] sm:$0xff]  ;;  %v259_v33 = vld [vmem:[%s2702_s2 + $0x20] sm:$0xff]  ;;  %v2290_v34 = vmov 0.0|0.0   ;;  %vm2291_vm8 = vmmov 0   ;;  %s2293_s20 = smov 64  }
   0xc   :  { %2070 = vmatpush3.bf16.msra.mxu1 %v2049_v10  ;;  %2052 = vmatpush3.bf16.msra.mxu0 %v2049_v10  ;;  %v2085_v35 = vpack.c.bf16 %v258_v32, %v257_v30  ;;  %v260_v36 = vld [vmem:[%s2702_s2 + $0x28] sm:$0xff]  ;;  %v352_v37 = vld [vmem:[%s2704_s4] sm:$0xff]  ;;  %v261_v41 = vld [vmem:[%s2702_s2 + $0x30] sm:$0xff]  ;;  %vm252_vm9 = vcmask 261120   ;;  %vm270_vm10 = vcmask 523264   ;;  %vm1204_vm11 = vcmask 130048  }
   0xd   :  { %2072 = vmatprep.subr.bf16.mxu1 %v2053_v13  ;;  %2054 = vmatprep.subr.bf16.mxu0 %v2053_v13  ;;  %v353_v38 = vld [vmem:[%s2704_s4 + $0x8] sm:$0xff]  ;;  %v2089_v40 = vpack.c.bf16 %v260_v36, %v259_v33  ;;  %v262_v42 = vld [vmem:[%s2702_s2 + $0x38] sm:$0xff]  ;;  %v354_v44 = vld [vmem:[%s2704_s4 + $0x10] sm:$0xff]  ;;  %s2292_s2 = smov 32   ;;  %vm1257_vm12 = vcmask 1041408   ;;  %vm1261_vm13 = vcmask 1045504  }
   0xe   :  { %2186 = vset.pattern.permute.xlu0 %v2287_v4  ;;  %v2437_v39 = vpack.c.bf16 %v353_v38, %v352_v37  ;;  %v2093_v43 = vpack.c.bf16 %v262_v42, %v261_v41  ;;  %v355_v45 = vld [vmem:[%s2704_s4 + $0x18] sm:$0xff]  ;;  %v1745_v57 = vld [vmem:[%s2703_s3] ss:$0 sm:$0xff]  ;;  %vm1259_vm14 = vcmask 1043456   ;;  %vm1370_vm15 = vcmask 195584   ;;  %s2296_s15 = smov 6  }
   0xf   :  { %v2454_v46 = vpack.c.bf16 %v355_v45, %v354_v44  ;;  %s2297_s0 = smov 8   ;;  %s2298_s16 = smov 10   ;;  %vm1516_vm1 = vcmask 15360  }
  0x10   :  { %2074 = vmatpush3.bf16.msra.mxu1 %v2053_v13  ;;  %2056 = vmatpush3.bf16.msra.mxu0 %v2053_v13  ;;  %s2299_s17 = smov 14   ;;  %s2300_s1 = smov 1  }
  0x11   :  { %2077 = vmatprep.subr.msk.bf16.mxu1 %vm2058_vm2, %v2057_v16  ;;  %2059 = vmatprep.subr.msk.bf16.mxu0 %vm2058_vm2, %v2057_v16  ;;  %s2301_s18 = smov 12   ;;  %s2302_s24 = smov 127  }
  0x12   :  { %s2303_s8 = smov [#allocation3]  }
  0x14   :  { %2080 = vmatpush3.bf16.msk.msra.mxu1 %vm2058_vm2, %v2057_v16  ;;  %2062 = vmatpush3.bf16.msk.msra.mxu0 %vm2058_vm2, %v2057_v16  ;;  %vm1518_vm2 = vcmask 31744  }
  0x15   :  { %2097 = vmatprep.subr.bf16.mxu1 %v2290_v34  ;;  %2082 = vmatprep.subr.bf16.mxu0 %v2081_v31 }
  0x84   :  { %v153_v19 = vpop.permute.xlu0 %152  ;;  %v55_v20 = vpop.permute.xlu1 %54 }
  0x85   :  { %vm157_vm4 = vcmp.eq.s32.totalorder %v2398_v18, %v153_v19  ;;  %vm59_vm5 = vcmp.eq.s32.totalorder %v2398_v18, %v55_v20 }
  0x86   :  { %v1740_v22 = vsel %vm157_vm4, 1.0, %v2289_v21  ;;  %v1735_v23 = vsel %vm59_vm5, 1.0, %v2289_v21  ;;  %vm1522_vm4 = vcmask 64512   ;;  %vm1550_vm5 = vcmask 7168  }
  0x87   :  { %1897 = vmatprep.mubr.msk.f32.mxu1 %vm65_vm3, %v1740_v22  ;;  %1878 = vmatprep.mubr.msk.f32.mxu0 %vm65_vm3, %v1735_v23 }
  0x88   :  { %v156_v24 = vpop.permute.xlu0 %155  ;;  %v58_v25 = vpop.permute.xlu1 %57 }
  0x89   :  { %vm158_vm6 = vcmp.eq.s32.totalorder %v2398_v18, %v156_v24  ;;  %vm60_vm7 = vcmp.eq.s32.totalorder %v2398_v18, %v58_v25 }
  0x8a   :  { %v1741_v26 = vsel %vm158_vm6, 1.0, %v2289_v21  ;;  %v1736_v27 = vsel %vm60_vm7, 1.0, %v2289_v21  ;;  %vm1524_vm6 = vcmask 80896   ;;  %vm1526_vm7 = vcmask 97280  }
  0x8b   :  { %1898 = vmatmul.mubr.msk.f32.vlgmr.msra.gmra.mrb[0].mxu1 %vm65_vm3, %v1741_v26  ;;  %1879 = vmatmul.mubr.msk.f32.vlgmr.msra.gmra.mrb[0].mxu0 %vm65_vm3, %v1736_v27  ;;  %vm1520_vm3 = vcmask 48128  }
  0x8c   :  { %2084 = vmatpush3.bf16.msra.mxu0 %v2081_v31  ;;  %2099 = vmatpush3.bf16.msra.mxu1 %v2437_v39 }
  0x8d   :  { %2086 = vmatprep.subr.bf16.mxu0 %v2085_v35  ;;  %2100 = vmatprep.subr.bf16.mxu1 %v2290_v34 }
  0x8e   :  { %1927 = vmatprep.mubr.msk.f32.mxu1 %vm2291_vm8, %v2289_v21 }
  0x90   :  { %2088 = vmatpush3.bf16.msra.mxu0 %v2085_v35  ;;  %2102 = vmatpush3.bf16.msra.mxu1 %v2454_v46 }
  0x91   :  { %2090 = vmatprep.subr.bf16.mxu0 %v2089_v40  ;;  %2103 = vmatprep.subr.bf16.mxu1 %v2290_v34 }
  0x93   :  { %1928 = vmatmul.mubr.f32.vlgmr.msra.gmra.mrb[2].mxu1 %v2289_v21 }
  0x94   :  { %2092 = vmatpush3.bf16.msra.mxu0 %v2089_v40  ;;  %2105 = vmatpush3.bf16.msra.mxu1 %v2437_v39 }
  0x95   :  { %2094 = vmatprep.subr.bf16.mxu0 %v2093_v43  ;;  %1938 = vmatprep.mubr.msk.f32.mxu1 %vm2291_vm8, %v2289_v21 }
  0x96   :  { %2106 = vmatprep.subr.bf16.mxu1 %v2290_v34 }
  0x98   :  { %2096 = vmatpush3.bf16.msra.mxu0 %v2093_v43  ;;  %2108 = vmatpush3.bf16.msra.mxu1 %v2454_v46 }
  0x99   :  { %2109 = vmatprep.subr.bf16.mxu0 %v2290_v34  ;;  %2115 = vmatprep.subr.bf16.mxu1 %v2290_v34 }
 0x15e   :  { %v1899_v47 = vpop.f32.mrb[0].mxu1  ;;  %v1880_v48 = vpop.f32.mrb[0].mxu0 }
 0x15f   :  { %248 = vrot.lane.b32.xlu1 %v1899_v47, %s2292_s2  ;;  %v235_v49 = vpop.f32.mrb[1].mxu1  ;;  %v142_v50 = vpop.f32.mrb[1].mxu0 }
 0x160   :  { %246 = vrot.lane.b32.xlu0 %v235_v49, %s2292_s2 }
 0x166   :  { %v425_v55 = vpop.f32.mrb[2].mxu1 }
 0x167   :  { %v1929_v56 = vpop.f32.mrb[3].mxu1 }
 0x1d1   :  { %v249_v51 = vpop.permute.xlu1 %248 }
 0x1d2   :  { %v247_v52 = vpop.permute.xlu0 %246  ;;  %v254_v54 = vsel %vm252_vm9, %v1880_v48, %v249_v51 }
 0x1d3   :  { %v253_v53 = vsel %vm252_vm9, %v142_v50, %v247_v52 }
 0x1d4   :  { %1916 = vmatprep.mubr.msk.f32.mxu0 %vm270_vm10, %v253_v53 }
 0x1d5   :  { %1917 = vmatmul.mubr.msk.f32.vlgmr.msra.gmra.mrb[2].mxu0 %vm270_vm10, %v254_v54  ;;  %vm1719_vm10 = vcmask 25600  }
 0x1d6   :  { %2111 = vmatpush3.bf16.msra.mxu0 %v2437_v39  ;;  %1949 = vmatprep.mubr.msk.f32.mxu0 %vm2291_vm8, %v2289_v21 }
 0x1d7   :  { %2112 = vmatprep.subr.bf16.mxu0 %v2290_v34 }
 0x1da   :  { %2114 = vmatpush3.bf16.msra.mxu0 %v2454_v46 }
 0x1db   :  { %2121 = vmatprep.subr.bf16.mxu0 %v2290_v34 }
 0x2a8   :  { %v1918_v58 = vpop.f32.mrb[2].mxu0 }
 0x2a9   :  { %v2480_v59 = vadd.f32 %v1918_v58, %v1745_v57  ;;  %v343_v60 = vpop.f32.mrb[3].mxu0 }
 0x2aa   :  { %v2482_v61 = vadd.f32 %v1745_v57, %v343_v60 }
 0x2ac   :  { %v429_v62 = vadd.f32 %v425_v55, %v2482_v61 }
 0x2ae   :  { %2192 = vtanh.f32 %v429_v62  ;;  %v1748_v0 = vmul.f32 -1.442695, %v429_v62 }
 0x2b0   :  { %2194 = vpow2.f32 %v1748_v0 }
 0x2b8   :  { %v2193_v63 = vpop.eup %2192 }
 0x2b9   :  { %439 = vrot.lane.b32.xlu0 %v2193_v63, %s2293_s20 }
 0x2ba   :  { %v2195_v1 = vpop.eup %2194 }
 0x2bb   :  { %v433_v2 = vadd.f32 1.0, %v2195_v1 }
 0x2bd   :  { %2196 = vrcp.f32 %v433_v2 }
 0x2c7   :  { %v2197_v3 = vpop.eup %2196 }
 0x2c8   :  { %v437_v6 = vmul.f32 0.0, %v2197_v3 }
 0x32b   :  { %v440_v4 = vpop.permute.xlu0 %439 }
 0x32c   :  { %v442_v5 = vmul.f32 %v2197_v3, %v440_v4 }
 0x32e   :  { %444 = vrot.lane.b32.xlu1 %v442_v5, %s2292_s2 }
 0x3a0   :  { %v445_v7 = vpop.permute.xlu1 %444 }
 0x3a1   :  { %v447_v8 = vadd.f32 %v445_v7, %v437_v6 }
 0x3a3   :  { %2198 = vtanh.f32 %v447_v8  ;;  %v541_v27 = vrot.slane %v447_v8, 6 }
 0x3ad   :  { %v2199_v9 = vpop.eup %2198 }
 0x3ae   :  { %450 = vrot.lane.b32.xlu0 %v2199_v9, %s2293_s20 }
 0x420   :  { %v451_v10 = vpop.permute.xlu0 %450 }
 0x421   :  { %v2488_v11 = vmul.f32 %v2197_v3, %v451_v10 }
 0x423   :  { %455 = vrot.lane.b32.xlu1 %v2488_v11, %s2292_s2 }
 0x495   :  { %v2492_v12 = vpop.permute.xlu1 %455 }
 0x496   :  { %1939 = vmatmul.mubr.msk.f32.vlgmr.msra.gmra.mrb[4].mxu1 %vm252_vm9, %v2492_v12 }
 0x497   :  { %2117 = vmatpush3.bf16.msra.mxu1 %v2437_v39  ;;  %1960 = vmatprep.mubr.msk.f32.mxu1 %vm2291_vm8, %v2289_v21 }
 0x498   :  { %2118 = vmatprep.subr.bf16.mxu1 %v2290_v34 }
 0x49b   :  { %2120 = vmatpush3.bf16.msra.mxu1 %v2454_v46 }
 0x49c   :  { %2127 = vmatprep.subr.bf16.mxu1 %v2290_v34 }
 0x569   :  { %v525_v13 = vpop.f32.mrb[4].mxu1 }
 0x56a   :  { %v530_v14 = vrot.slane %v525_v13, 6  ;;  %v1940_v15 = vpop.f32.mrb[5].mxu1 }
 0x56c   :  { %v532_v16 = vadd.f32 %v530_v14, %v2482_v61 }
 0x56e   :  { %2200 = vtanh.f32 %v532_v16  ;;  %v1750_v20 = vmul.f32 -1.442695, %v532_v16 }
 0x570   :  { %2202 = vpow2.f32 %v1750_v20 }
 0x578   :  { %v2201_v19 = vpop.eup %2200 }
 0x579   :  { %545 = vrot.lane.b32.xlu0 %v2201_v19, %s2293_s20 }
 0x57a   :  { %v2203_v22 = vpop.eup %2202 }
 0x57b   :  { %v536_v23 = vadd.f32 1.0, %v2203_v22 }
 0x57d   :  { %2204 = vrcp.f32 %v536_v23 }
 0x587   :  { %v2205_v24 = vpop.eup %2204 }
 0x588   :  { %v543_v28 = vmul.f32 %v2205_v24, %v541_v27 }
 0x5eb   :  { %v546_v25 = vpop.permute.xlu0 %545 }
 0x5ec   :  { %v548_v26 = vmul.f32 %v2205_v24, %v546_v25 }
 0x5ee   :  { %550 = vrot.lane.b32.xlu1 %v548_v26, %s2292_s2 }
 0x660   :  { %v551_v29 = vpop.permute.xlu1 %550 }
 0x661   :  { %v553_v30 = vadd.f32 %v551_v29, %v543_v28 }
 0x663   :  { %2206 = vtanh.f32 %v553_v30  ;;  %v648_v50 = vrot.slane %v553_v30, 6 }
 0x66d   :  { %v2207_v31 = vpop.eup %2206 }
 0x66e   :  { %556 = vrot.lane.b32.xlu0 %v2207_v31, %s2293_s20 }
 0x6e0   :  { %v557_v32 = vpop.permute.xlu0 %556 }
 0x6e1   :  { %v2506_v33 = vmul.f32 %v2205_v24, %v557_v32 }
 0x6e3   :  { %v561_v35 = vrot.slane %v2506_v33, 2 }
 0x6e5   :  { %562 = vrot.lane.b32.xlu1 %v561_v35, %s2292_s2 }
 0x757   :  { %v563_v36 = vpop.permute.xlu1 %562 }
 0x758   :  { %1950 = vmatmul.mubr.msk.f32.vlgmr.msra.gmra.mrb[4].mxu0 %vm252_vm9, %v563_v36 }
 0x759   :  { %2123 = vmatpush3.bf16.msra.mxu0 %v2437_v39  ;;  %1971 = vmatprep.mubr.msk.f32.mxu0 %vm2291_vm8, %v2289_v21 }
 0x75a   :  { %2124 = vmatprep.subr.bf16.mxu0 %v2290_v34 }
 0x75d   :  { %2126 = vmatpush3.bf16.msra.mxu0 %v2454_v46 }
 0x75e   :  { %2133 = vmatprep.subr.bf16.mxu0 %v2290_v34 }
 0x82b   :  { %v632_v37 = vpop.f32.mrb[4].mxu0 }
 0x82c   :  { %v637_v38 = vrot.slane %v632_v37, 4  ;;  %v1951_v40 = vpop.f32.mrb[5].mxu0 }
 0x82e   :  { %v639_v41 = vadd.f32 %v637_v38, %v2482_v61 }
 0x830   :  { %2208 = vtanh.f32 %v639_v41  ;;  %v1752_v43 = vmul.f32 -1.442695, %v639_v41 }
 0x832   :  { %2210 = vpow2.f32 %v1752_v43 }
 0x83a   :  { %v2209_v42 = vpop.eup %2208 }
 0x83b   :  { %652 = vrot.lane.b32.xlu0 %v2209_v42, %s2293_s20 }
 0x83c   :  { %v2211_v44 = vpop.eup %2210 }
 0x83d   :  { %v643_v45 = vadd.f32 1.0, %v2211_v44 }
 0x83f   :  { %2212 = vrcp.f32 %v643_v45 }
 0x849   :  { %v2213_v47 = vpop.eup %2212 }
 0x84a   :  { %v650_v51 = vmul.f32 %v2213_v47, %v648_v50 }
 0x8ad   :  { %v653_v48 = vpop.permute.xlu0 %652 }
 0x8ae   :  { %v655_v49 = vmul.f32 %v2213_v47, %v653_v48 }
 0x8b0   :  { %657 = vrot.lane.b32.xlu1 %v655_v49, %s2292_s2 }
 0x922   :  { %v658_v52 = vpop.permute.xlu1 %657 }
 0x923   :  { %v660_v53 = vadd.f32 %v658_v52, %v650_v51 }
 0x925   :  { %2214 = vtanh.f32 %v660_v53  ;;  %v755_v8 = vrot.slane %v660_v53, 6 }
 0x92f   :  { %v2215_v54 = vpop.eup %2214 }
 0x930   :  { %663 = vrot.lane.b32.xlu0 %v2215_v54, %s2293_s20 }
 0x9a2   :  { %v664_v55 = vpop.permute.xlu0 %663 }
 0x9a3   :  { %v2521_v56 = vmul.f32 %v2213_v47, %v664_v55 }
 0x9a5   :  { %v668_v57 = vrot.slane %v2521_v56, 4 }
 0x9a7   :  { %669 = vrot.lane.b32.xlu1 %v668_v57, %s2292_s2 }
 0xa19   :  { %v670_v58 = vpop.permute.xlu1 %669 }
 0xa1a   :  { %1961 = vmatmul.mubr.msk.f32.vlgmr.msra.gmra.mrb[6].mxu1 %vm252_vm9, %v670_v58 }
 0xa1b   :  { %2129 = vmatpush3.bf16.msra.mxu1 %v2437_v39  ;;  %1982 = vmatprep.mubr.msk.f32.mxu1 %vm2291_vm8, %v2289_v21 }
 0xa1c   :  { %2130 = vmatprep.subr.bf16.mxu1 %v2290_v34 }
 0xa1f   :  { %2132 = vmatpush3.bf16.msra.mxu1 %v2454_v46 }
 0xa20   :  { %2139 = vmatprep.subr.bf16.mxu1 %v2290_v34 }
 0xaed   :  { %v739_v60 = vpop.f32.mrb[6].mxu1 }
 0xaee   :  { %v744_v62 = vrot.slane %v739_v60, 2  ;;  %v1962_v63 = vpop.f32.mrb[7].mxu1 }
 0xaf0   :  { %v746_v0 = vadd.f32 %v744_v62, %v2482_v61 }
 0xaf2   :  { %2216 = vtanh.f32 %v746_v0  ;;  %v1754_v2 = vmul.f32 -1.442695, %v746_v0 }
 0xaf4   :  { %2218 = vpow2.f32 %v1754_v2 }
 0xafc   :  { %v2217_v1 = vpop.eup %2216 }
 0xafd   :  { %759 = vrot.lane.b32.xlu0 %v2217_v1, %s2293_s20 }
 0xafe   :  { %v2219_v3 = vpop.eup %2218 }
 0xaff   :  { %v750_v4 = vadd.f32 1.0, %v2219_v3 }
 0xb01   :  { %2220 = vrcp.f32 %v750_v4 }
 0xb0b   :  { %v2221_v5 = vpop.eup %2220 }
 0xb0c   :  { %v757_v9 = vmul.f32 %v2221_v5, %v755_v8 }
 0xb6f   :  { %v760_v6 = vpop.permute.xlu0 %759 }
 0xb70   :  { %v762_v7 = vmul.f32 %v2221_v5, %v760_v6 }
 0xb72   :  { %764 = vrot.lane.b32.xlu1 %v762_v7, %s2292_s2 }
 0xbe4   :  { %v765_v10 = vpop.permute.xlu1 %764 }
 0xbe5   :  { %v767_v13 = vadd.f32 %v765_v10, %v757_v9 }
 0xbe7   :  { %2222 = vtanh.f32 %v767_v13  ;;  %v859_v31 = vrot.slane %v767_v13, 6 }
 0xbf1   :  { %v2223_v61 = vpop.eup %2222 }
 0xbf2   :  { %770 = vrot.lane.b32.xlu0 %v2223_v61, %s2293_s20 }
 0xc64   :  { %v771_v14 = vpop.permute.xlu0 %770 }
 0xc65   :  { %v2536_v15 = vmul.f32 %v2221_v5, %v771_v14 }
 0xc67   :  { %v775_v16 = vrot.slane %v2536_v15, 6 }
 0xc69   :  { %776 = vrot.lane.b32.xlu1 %v775_v16, %s2292_s2 }
 0xcdb   :  { %v2540_v19 = vpop.permute.xlu1 %776 }
 0xcdc   :  { %1972 = vmatmul.mubr.msk.f32.vlgmr.msra.gmra.mrb[6].mxu0 %vm252_vm9, %v2540_v19 }
 0xcdd   :  { %2135 = vmatpush3.bf16.msra.mxu0 %v2437_v39  ;;  %1993 = vmatprep.mubr.msk.f32.mxu0 %vm2291_vm8, %v2289_v21 }
 0xcde   :  { %2136 = vmatprep.subr.bf16.mxu0 %v2290_v34 }
 0xce1   :  { %2138 = vmatpush3.bf16.msra.mxu0 %v2454_v46 }
 0xdaf   :  { %v846_v20 = vpop.f32.mrb[6].mxu0 }
 0xdb0   :  { %v850_v22 = vadd.f32 %v846_v20, %v2480_v59  ;;  %v1973_v23 = vpop.f32.mrb[7].mxu0 }
 0xdb2   :  { %2224 = vtanh.f32 %v850_v22  ;;  %v1756_v25 = vmul.f32 -1.442695, %v850_v22 }
 0xdb4   :  { %2226 = vpow2.f32 %v1756_v25 }
 0xdbc   :  { %v2225_v24 = vpop.eup %2224 }
 0xdbd   :  { %863 = vrot.lane.b32.xlu0 %v2225_v24, %s2293_s20 }
 0xdbe   :  { %v2227_v26 = vpop.eup %2226 }
 0xdbf   :  { %v854_v27 = vadd.f32 1.0, %v2227_v26 }
 0xdc1   :  { %2228 = vrcp.f32 %v854_v27 }
 0xdcb   :  { %v2229_v28 = vpop.eup %2228 }
 0xdcc   :  { %v861_v32 = vmul.f32 %v2229_v28, %v859_v31 }
 0xe2f   :  { %v864_v29 = vpop.permute.xlu0 %863 }
 0xe30   :  { %v866_v30 = vmul.f32 %v2229_v28, %v864_v29 }
 0xe32   :  { %868 = vrot.lane.b32.xlu1 %v866_v30, %s2292_s2 }
 0xea4   :  { %v869_v35 = vpop.permute.xlu1 %868 }
 0xea5   :  { %v871_v36 = vadd.f32 %v869_v35, %v861_v32 }
 0xea7   :  { %2230 = vtanh.f32 %v871_v36 }
 0xeb1   :  { %v2231_v37 = vpop.eup %2230 }
 0xeb2   :  { %874 = vrot.lane.b32.xlu0 %v2231_v37, %s2293_s20 }
 0xf24   :  { %v875_v38 = vpop.permute.xlu0 %874 }
 0xf25   :  { %v2553_v40 = vmul.f32 %v2229_v28, %v875_v38 }
 0xf27   :  { %879 = vrot.lane.b32.xlu1 %v2553_v40, %s2292_s2 }
 0xf99   :  { %v2557_v41 = vpop.permute.xlu1 %879 }
 0xf9a   :  { %1983 = vmatmul.mubr.msk.f32.vlgmr.msra.gmra.mrb[8].mxu1 %vm252_vm9, %v2557_v41 }
 0xf9b   :  { %2141 = vmatpush3.bf16.msra.mxu1 %v2437_v39  ;;  %2004 = vmatprep.mubr.msk.f32.mxu1 %vm2291_vm8, %v2289_v21 }
 0xf9c   :  { %2142 = vmatprep.subr.bf16.mxu1 %v2290_v34 }
 0xf9f   :  { %2144 = vmatpush3.bf16.msra.mxu1 %v2454_v46  ;;  %v965_v46 = vrot.slane %v871_v36, 6 }
0x106d   :  { %v949_v42 = vpop.f32.mrb[8].mxu1 }
0x106e   :  { %v954_v43 = vrot.slane %v949_v42, 6  ;;  %v1984_v44 = vpop.f32.mrb[9].mxu1 }
0x106f   :  { %v1225_v44 = vrot.slane %v2553_v40, 2  ;;  %v1266_v40 = vld [vmem:[%s2705_s5] sm:$0xff] }
0x1070   :  { %v956_v45 = vadd.f32 %v954_v43, %v2480_v59 }
0x1072   :  { %2232 = vtanh.f32 %v956_v45  ;;  %v1758_v48 = vmul.f32 -1.442695, %v956_v45  ;;  %v1244_v45 = vrot.slane %v2506_v33, 6 }
0x1074   :  { %2234 = vpow2.f32 %v1758_v48 }
0x107c   :  { %v2233_v47 = vpop.eup %2232 }
0x107d   :  { %969 = vrot.lane.b32.xlu0 %v2233_v47, %s2293_s20 }
0x107e   :  { %v2235_v49 = vpop.eup %2234 }
0x107f   :  { %v960_v39 = vadd.f32 1.0, %v2235_v49 }
0x1081   :  { %2236 = vrcp.f32 %v960_v39 }
0x108b   :  { %v2237_v50 = vpop.eup %2236 }
0x108c   :  { %v967_v53 = vmul.f32 %v2237_v50, %v965_v46 }
0x10ef   :  { %v970_v51 = vpop.permute.xlu0 %969 }
0x10f0   :  { %v972_v52 = vmul.f32 %v2237_v50, %v970_v51  ;;  %v1267_v51 = vld [vmem:[%s2705_s5 + $0x8] sm:$0xff] }
0x10f2   :  { %974 = vrot.lane.b32.xlu1 %v972_v52, %s2292_s2 }
0x1164   :  { %v975_v54 = vpop.permute.xlu1 %974 }
0x1165   :  { %v977_v55 = vadd.f32 %v975_v54, %v967_v53 }
0x1167   :  { %2238 = vtanh.f32 %v977_v55  ;;  %v1072_v13 = vrot.slane %v977_v55, 6  ;;  %v1252_v55 = vrot.slane %v2488_v11, 2 }
0x1171   :  { %v2239_v57 = vpop.eup %2238 }
0x1172   :  { %980 = vrot.lane.b32.xlu0 %v2239_v57, %s2293_s20 }
0x11e4   :  { %v981_v58 = vpop.permute.xlu0 %980 }
0x11e5   :  { %v2570_v60 = vmul.f32 %v2237_v50, %v981_v58 }
0x11e7   :  { %v985_v62 = vrot.slane %v2570_v60, 2  ;;  %v1217_v43 = vrot.slane %v2570_v60, 6 }
0x11e9   :  { %986 = vrot.lane.b32.xlu1 %v985_v62, %s2292_s2 }
0x125b   :  { %v987_v63 = vpop.permute.xlu1 %986 }
0x125c   :  { %1994 = vmatmul.mubr.msk.f32.vlgmr.msra.gmra.mrb[8].mxu0 %vm252_vm9, %v987_v63 }
0x132f   :  { %v1056_v0 = vpop.f32.mrb[8].mxu0 }
0x1330   :  { %v1061_v1 = vrot.slane %v1056_v0, 4  ;;  %v1995_v2 = vpop.f32.mrb[9].mxu0 }
0x1332   :  { %v1063_v3 = vadd.f32 %v1061_v1, %v2480_v59 }
0x1334   :  { %2240 = vtanh.f32 %v1063_v3  ;;  %v1760_v5 = vmul.f32 -1.442695, %v1063_v3 }
0x1336   :  { %2242 = vpow2.f32 %v1760_v5 }
0x133e   :  { %v2241_v4 = vpop.eup %2240 }
0x133f   :  { %1076 = vrot.lane.b32.xlu0 %v2241_v4, %s2293_s20 }
0x1340   :  { %v2243_v6 = vpop.eup %2242 }
0x1341   :  { %v1067_v7 = vadd.f32 1.0, %v2243_v6 }
0x1343   :  { %2244 = vrcp.f32 %v1067_v7 }
0x134d   :  { %v2245_v8 = vpop.eup %2244 }
0x134e   :  { %v1074_v61 = vmul.f32 %v2245_v8, %v1072_v13  ;;  %v1232_v13 = vsel %vm1204_vm11, %v2557_v41, %v2540_v19  ;;  %v1360_v41 = vld [vmem:[%s2707_s7] sm:$0xff] }
0x13b1   :  { %v1077_v9 = vpop.permute.xlu0 %1076 }
0x13b2   :  { %v1079_v10 = vmul.f32 %v2245_v8, %v1077_v9 }
0x13b4   :  { %1081 = vrot.lane.b32.xlu1 %v1079_v10, %s2292_s2 }
0x1426   :  { %v1082_v14 = vpop.permute.xlu1 %1081 }
0x1427   :  { %v1084_v16 = vadd.f32 %v1082_v14, %v1074_v61 }
0x1429   :  { %2246 = vtanh.f32 %v1084_v16  ;;  %v1179_v47 = vrot.slane %v1084_v16, 6 }
0x1433   :  { %v2247_v20 = vpop.eup %2246 }
0x1434   :  { %1087 = vrot.lane.b32.xlu0 %v2247_v20, %s2293_s20 }
0x14a6   :  { %v1088_v22 = vpop.permute.xlu0 %1087 }
0x14a7   :  { %v1090_v23 = vmul.f32 %v2245_v8, %v1088_v22 }
0x14a9   :  { %v1092_v24 = vrot.slane %v1090_v23, 4  ;;  %v1209_v42 = vrot.slane %v1090_v23, 2 }
0x14ab   :  { %1093 = vrot.lane.b32.xlu1 %v1092_v24, %s2292_s2 }
0x151d   :  { %v1094_v25 = vpop.permute.xlu1 %1093 }
0x151e   :  { %2005 = vmatmul.mubr.msk.f32.vlgmr.msra.gmra.mrb[10].mxu1 %vm252_vm9, %v1094_v25  ;;  %v1361_v25 = vld [vmem:[%s2707_s7 + $0x8] sm:$0xff] }
0x15f1   :  { %v1163_v26 = vpop.f32.mrb[10].mxu1 }
0x15f2   :  { %v1168_v27 = vrot.slane %v1163_v26, 2  ;;  %v2006_v28 = vpop.f32.mrb[11].mxu1  ;;  %v2153_v26 = vpack.c.bf16 %v1361_v25, %v1360_v41 }
0x15f3   :  { %v1763_v28 = vld [vmem:[%s2706_s6] ss:$0 sm:$0xff]  ;;  %s2294_s6 = smov 4  }
0x15f4   :  { %v1170_v29 = vadd.f32 %v1168_v27, %v2480_v59  ;;  %v1236_v59 = vrot.slane %v2521_v56, 2  ;;  %2154 = vmatprep.subr.bf16.mxu1 %v2153_v26  ;;  %v1362_v27 = vld [vmem:[%s2707_s7 + $0x10] sm:$0xff]  ;;  %s2295_s7 = smov 2  }
0x15f5   :  { %2156 = vmatpush3.bf16.msra.mxu1 %v2153_v26 }
0x15f6   :  { %2248 = vtanh.f32 %v1170_v29  ;;  %v1762_v31 = vmul.f32 -1.442695, %v1170_v29  ;;  %2022 = vmatprep.subr.mxu1 %v1362_v27 }
0x15f8   :  { %2250 = vpow2.f32 %v1762_v31 }
0x15f9   :  { %2023 = vmatpush3.msra.mxu1 %v1362_v27 }
0x15fa   :  { %2157 = vmatprep.subr.bf16.mxu1 %v2290_v34 }
0x1600   :  { %v2249_v30 = vpop.eup %2248 }
0x1601   :  { %1183 = vrot.lane.b32.xlu0 %v2249_v30, %s2293_s20 }
0x1602   :  { %v2251_v32 = vpop.eup %2250 }
0x1603   :  { %v1174_v35 = vadd.f32 1.0, %v2251_v32 }
0x1605   :  { %2252 = vrcp.f32 %v1174_v35 }
0x160f   :  { %v2253_v36 = vpop.eup %2252 }
0x1610   :  { %v1181_v48 = vmul.f32 %v2253_v36, %v1179_v47 }
0x1673   :  { %v1184_v37 = vpop.permute.xlu0 %1183 }
0x1674   :  { %v1186_v38 = vmul.f32 %v2253_v36, %v1184_v37  ;;  %v1766_v37 = vld [vmem:[#allocation2] ss:$0 sm:$0xff] }
0x1676   :  { %1188 = vrot.lane.b32.xlu1 %v1186_v38, %s2292_s2 }
0x167a   :  { %1210 = vrot.lane.b32.xlu1 %v1209_v42, %s2292_s2 }
0x167e   :  { %1218 = vrot.lane.b32.xlu1 %v1217_v43, %s2292_s2 }
0x1682   :  { %1237 = vrot.lane.b32.xlu1 %v1236_v59, %s2292_s2 }
0x1686   :  { %1226 = vrot.lane.b32.xlu1 %v1225_v44, %s2292_s2 }
0x168a   :  { %1245 = vrot.lane.b32.xlu1 %v1244_v45, %s2292_s2 }
0x16e8   :  { %v1189_v49 = vpop.permute.xlu1 %1188 }
0x16e9   :  { %v1191_v39 = vadd.f32 %v1189_v49, %v1181_v48 }
0x16eb   :  { %2254 = vtanh.f32 %v1191_v39 }
0x16ec   :  { %v1211_v57 = vpop.permute.xlu1 %1210 }
0x16f5   :  { %v2255_v50 = vpop.eup %2254 }
0x16f6   :  { %1194 = vrot.lane.b32.xlu0 %v2255_v50, %s2293_s20 }
0x16fa   :  { %1206 = vrot.lane.b32.xlu0 %v2506_v33, %s2292_s2  ;;  %v2145_v33 = vpack.c.bf16 %v1267_v51, %v1266_v40 }
0x16fc   :  { %2146 = vmatprep.subr.bf16.mxu0 %v2145_v33 }
0x16fd   :  { %2148 = vmatpush3.bf16.msra.mxu0 %v2145_v33 }
0x16fe   :  { %1214 = vrot.lane.b32.xlu0 %v2521_v56, %s2292_s2  ;;  %v1268_v56 = vld [vmem:[%s2705_s5 + $0x10] sm:$0xff] }
0x1702   :  { %1233 = vrot.lane.b32.xlu0 %v2570_v60, %s2292_s2  ;;  %v1219_v60 = vpop.permute.xlu1 %1218 }
0x1706   :  { %1222 = vrot.lane.b32.xlu0 %v2536_v15, %s2292_s2  ;;  %v1269_v15 = vld [vmem:[%s2705_s5 + $0x18] sm:$0xff]  ;;  %v1238_v63 = vpop.permute.xlu1 %1237  ;;  %s1727_s5 = sshll.u32 %s2303_s8, 4  ;;  %s1728_s5 = int_to_ptr.vmem [resolvable:$true] %s1727_s5 }
0x1707   :  { %v2149_v52 = vpack.c.bf16 %v1269_v15, %v1268_v56  ;;  %p2267_p1 = scmp.lt.s32.totalorder %s1728_s5, %s1728_s5 }
0x1709   :  { %2150 = vmatprep.subr.bf16.mxu0 %v2149_v52 }
0x170a   :  { %1241 = vrot.lane.b32.xlu0 %v1090_v23, %s2292_s2  ;;  %2152 = vmatpush3.bf16.msra.mxu0 %v2149_v52  ;;  %v1227_v1 = vpop.permute.xlu1 %1226 }
0x170b   :  { %2160 = vmatprep.subr.bf16.mxu0 %v2290_v34 }
0x170e   :  { %v1246_v3 = vpop.permute.xlu1 %1245 }
0x1768   :  { %v1195_v46 = vpop.permute.xlu0 %1194 }
0x1769   :  { %v1197_v53 = vmul.f32 %v2253_v36, %v1195_v46 }
0x176b   :  { %v1200_v54 = vrot.slane %v1197_v53, 6  ;;  %1249 = vrot.lane.b32.xlu0 %v1197_v53, %s2292_s2 }
0x176c   :  { %v1207_v58 = vpop.permute.xlu0 %1206 }
0x176d   :  { %1201 = vrot.lane.b32.xlu1 %v1200_v54, %s2292_s2  ;;  %v1213_v6 = vsel %vm1204_vm11, %v1207_v58, %v1211_v57 }
0x1770   :  { %v1215_v62 = vpop.permute.xlu0 %1214 }
0x1771   :  { %1253 = vrot.lane.b32.xlu1 %v1252_v55, %s2292_s2  ;;  %v1221_v8 = vsel %vm1204_vm11, %v1215_v62, %v1219_v60 }
0x1774   :  { %v1234_v0 = vpop.permute.xlu0 %1233 }
0x1775   :  { %v1240_v7 = vsel %vm1204_vm11, %v1234_v0, %v1238_v63 }
0x1776   :  { %v1263_v16 = vsel %vm1257_vm12, %v1232_v13, %v1240_v7 }
0x1778   :  { %v1223_v2 = vpop.permute.xlu0 %1222 }
0x1779   :  { %v1229_v61 = vsel %vm1204_vm11, %v1223_v2, %v1227_v1  ;;  %v1490_v1 = vshrl.u32 %v43_v17, 7 }
0x177b   :  { %vm1491_vm0 = vcmp.eq.s32.totalorder %v1490_v1, %v2398_v18 }
0x177c   :  { %v1242_v4 = vpop.permute.xlu0 %1241 }
0x177d   :  { %v1248_v9 = vsel %vm1204_vm11, %v1242_v4, %v1246_v3  ;;  %v1769_v4 = vsel %vm1491_vm0, 1.0, %v2289_v21 }
0x177e   :  { %v1264_v23 = vsel %vm1259_vm14, %v1263_v16, %v1248_v9 }
0x17dd   :  { %v1250_v20 = vpop.permute.xlu0 %1249 }
0x17df   :  { %v1202_v5 = vpop.permute.xlu1 %1201 }
0x17e0   :  { %v1205_v11 = vsel %vm1204_vm11, %v2492_v12, %v1202_v5 }
0x17e1   :  { %v1258_v10 = vsel %vm1257_vm12, %v1205_v11, %v1213_v6 }
0x17e2   :  { %v1260_v14 = vsel %vm1259_vm14, %v1258_v10, %v1221_v8 }
0x17e3   :  { %v1254_v12 = vpop.permute.xlu1 %1253  ;;  %v2634_v22 = vsel %vm1261_vm13, %v1260_v14, %v1229_v61 }
0x17e4   :  { %v1256_v24 = vsel %vm1204_vm11, %v1250_v20, %v1254_v12  ;;  %2015 = vmatprep.mubr.msk.f32.mxu0 %vm252_vm9, %v2634_v22 }
0x17e5   :  { %v2641_v19 = vsel %vm1261_vm13, %v1264_v23, %v1256_v24 }
0x17e6   :  { %2016 = vmatmul.mubr.msk.f32.vlgmr.msra.gmra.mrb[10].mxu0 %vm252_vm9, %v2641_v19 }
0x17e7   :  { %2042 = vmatprep.mubr.msk.f32.mxu0 %vm2291_vm8, %v2289_v21 }
0x18b9   :  { %v2017_v29 = vpop.f32.mrb[10].mxu0 }
0x18ba   :  { %v1355_v30 = vadd.f32 %v2017_v29, %v1763_v28  ;;  %v1349_v31 = vpop.f32.mrb[11].mxu0 }
0x18bb   :  { %v1350_v32 = vadd.f32 %v1763_v28, %v1349_v31 }
0x18bc   :  { %v1359_v36 = vmax.f32 %v1355_v30, 0.0 }
0x18bd   :  { %v1358_v35 = vmax.f32 %v1350_v32, 0.0  ;;  %v1633_v32 = vld [vmem:[%s2709_s9] sm:$0xff] }
0x18bf   :  { %2024 = vmatprep.mubr.msk.f32.mxu1 %vm1370_vm15, %v1358_v35  ;;  %v1634_v35 = vld [vmem:[%s2709_s9 + $0x8] sm:$0xff] }
0x18c0   :  { %2025 = vmatmul.mubr.msk.f32.vlgmr.msra.gmra.mrb[12].mxu1 %vm1370_vm15, %v1359_v36  ;;  %v1635_v36 = vld [vmem:[%s2709_s9 + $0x10] sm:$0xff] }
0x18c1   :  { %2031 = vmatprep.mubr.msk.f32.mxu1 %vm2291_vm8, %v2289_v21  ;;  %vm1528_vm8 = vcmask 113664  }
0x1993   :  { %v2026_v38 = vpop.f32.mrb[12].mxu1 }
0x1994   :  { %v1443_v42 = vpop.f32.mrb[13].mxu1  ;;  %v1449_v47 = vadd.f32 %v2026_v38, %v1766_v37  ;;  %v1636_v38 = vld [vmem:[%s2709_s9 + $0x18] sm:$0xff]  ;;  %s2262_s9 = scalar_lea.vmem %s1728_s5, 32 }
0x1995   :  { %v1444_v43 = vadd.f32 %v1766_v37, %v1443_v42  ;;  %v2161_v37 = vpack.c.bf16 %v1634_v35, %v1633_v32  ;;  %v2164_v42 = vpack.c.bf16 %v1636_v38, %v1635_v36  ;;  %p2263_p0 = scmp.ne.s32.totalorder %s1728_s5, %s2262_s9  ;;  %p2268_p2 = scmp.lt.s32.totalorder %s2262_s9, %s2262_s9 }
0x1996   :  { %v1464_v50 = vrot.slane %v1449_v47, 2  ;;  %v1467_v51 = vrot.slane %v1449_v47, 4  ;;  %v1470_v56 = vrot.slane %v1449_v47, 6 }
0x1997   :  { %v1453_v59 = vrot.slane %v1444_v43, 2  ;;  %v1456_v45 = vrot.slane %v1444_v43, 4  ;;  %v1459_v49 = vrot.slane %v1444_v43, 6  ;;  %2162 = vmatpush3.bf16.msra.mxu0 %v2161_v37  ;;  %p2269_p3 = por %p2268_p2, %p2267_p1 }
0x1998   :  { %2163 = vmatprep.subr.bf16.mxu0 %v2290_v34 }
0x1999   :  { %v1455_v44 = vmax.f32 %v1444_v43, %v1453_v59  ;;  %p2270_p4 = pnand %p2269_p3, %p2263_p0 }
0x199b   :  { %v1458_v48 = vmax.f32 %v1455_v44, %v1456_v45  ;;  %2165 = vmatpush3.bf16.msra.mxu0 %v2164_v42  ;;  %v1771_v45 = vld [vmem:[%s2710_s10] ss:$0 sm:$0xff] }
0x199d   :  { %v1461_v39 = vmax.f32 %v1458_v48, %v1459_v49 }
0x199f   :  { %v1462_v40 = vmax.f32 %v1461_v39, %v1449_v47 }
0x19a1   :  { %v1466_v33 = vmax.f32 %v1462_v40, %v1464_v50 }
0x19a3   :  { %v1469_v15 = vmax.f32 %v1466_v33, %v1467_v51 }
0x19a5   :  { %v1472_v52 = vmax.f32 %v1469_v15, %v1470_v56 }
0x19a7   :  { %v1474_v46 = vrot.slane %v1472_v52, 6  ;;  %v1476_v53 = vrot.slane %v1472_v52, 4  ;;  %v1478_v54 = vrot.slane %v1472_v52, 2 }
0x19a9   :  { %v1480_v55 = vsel %vm1257_vm12, %v1472_v52, %v1474_v46 }
0x19aa   :  { %v1481_v57 = vsel %vm1259_vm14, %v1480_v55, %v1476_v53 }
0x19ab   :  { %v1482_v58 = vsel %vm1261_vm13, %v1481_v57, %v1478_v54 }
0x19ac   :  { %v1483_v60 = vsub.f32 %v1444_v43, %v1482_v58  ;;  %v1484_v62 = vsub.f32 %v1449_v47, %v1482_v58 }
0x19ae   :  { %v1485_v63 = vmul.f32 1.442695, %v1483_v60  ;;  %v1487_v0 = vmul.f32 1.442695, %v1484_v62 }
0x19b0   :  { %2256 = vpow2.f32 %v1485_v63 }
0x19b1   :  { %2258 = vpow2.f32 %v1487_v0 }
0x19ba   :  { %v2257_v2 = vpop.eup %2256 }
0x19bb   :  { %v2259_v3 = vpop.eup %2258  ;;  %1532 = vperm.xlu0 %2186, %v2257_v2  }
0x19bc   :  { %1537 = vperm.xlu1 %2185, %v2259_v3  }
0x19bf   :  { %1498 = vrot.lane.b32.xlu0 %v1769_v4, %s2294_s6 }
0x19c0   :  { %1495 = vrot.lane.b32.xlu1 %v1769_v4, %s2295_s7 }
0x19c3   :  { %1501 = vrot.lane.b32.xlu0 %v1769_v4, %s2296_s15 }
0x19c4   :  { %1504 = vrot.lane.b32.xlu1 %v1769_v4, %s2297_s0 }
0x19c7   :  { %1507 = vrot.lane.b32.xlu0 %v1769_v4, %s2298_s16 }
0x19cb   :  { %1513 = vrot.lane.b32.xlu0 %v1769_v4, %s2299_s17 }
0x1a3a   :  { %v1533_v17 = vpop.permute.xlu0 %1532 }
0x1a3b   :  { %v1538_v18 = vpop.permute.xlu1 %1537  ;;  %v1540_v5 = vmul.f32 %v1533_v17, %v2634_v22 }
0x1a3c   :  { %v1541_v6 = vmul.f32 %v1538_v18, %v2641_v19 }
0x1a3e   :  { %v2187_v7 = vpack.i.bf16 %v1541_v6, %v1540_v5  ;;  %v1499_v11 = vpop.permute.xlu0 %1498 }
0x1a3f   :  { %v1496_v21 = vpop.permute.xlu1 %1495 }
0x1a40   :  { %2188 = vrot.lane.b32.xlu1 %v2187_v7, %s2300_s1  ;;  %v1517_v8 = vsel %vm1516_vm1, %v1769_v4, %v1496_v21 }
0x1a41   :  { %v1519_v10 = vsel %vm1518_vm2, %v1517_v8, %v1499_v11 }
0x1a42   :  { %v1502_v13 = vpop.permute.xlu0 %1501 }
0x1a43   :  { %v1505_v9 = vpop.permute.xlu1 %1504  ;;  %v1521_v61 = vsel %vm1520_vm3, %v1519_v10, %v1502_v13 }
0x1a44   :  { %1510 = vrot.lane.b32.xlu1 %v1769_v4, %s2301_s18  ;;  %v1523_v16 = vsel %vm1522_vm4, %v1521_v61, %v1505_v9 }
0x1a46   :  { %v1508_v20 = vpop.permute.xlu0 %1507 }
0x1a47   :  { %v1525_v19 = vsel %vm1524_vm6, %v1523_v16, %v1508_v20 }
0x1a4a   :  { %v1514_v27 = vpop.permute.xlu0 %1513 }
0x1ab2   :  { %v2189_v14 = vpop.permute.xlu1 %2188 }
0x1ab3   :  { %v2191_v12 = vunpack.i.h.bf16 %v2189_v14  ;;  %v2190_v22 = vunpack.i.l.bf16 %v2189_v14 }
0x1ab5   :  { %v1552_v23 = vsel %vm1550_vm5, %v2259_v3, %v2191_v12  ;;  %v1551_v24 = vsel %vm1550_vm5, %v2257_v2, %v2190_v22 }
0x1ab6   :  { %v2158_v41 = vpack.c.bf16 %v1552_v23, %v1551_v24  ;;  %v1511_v25 = vpop.permute.xlu1 %1510 }
0x1ab7   :  { %v1527_v26 = vsel %vm1526_vm7, %v1525_v19, %v1511_v25 }
0x1ab8   :  { %2159 = vmatpush3.bf16.msra.mxu1 %v2158_v41  ;;  %v1529_v28 = vsel %vm1528_vm8, %v1527_v26, %v1514_v27 }
0x1abb   :  { %2032 = vmatmul.mubr.msk.f32.vlgmr.msra.gmra.mrb[14].mxu1 %vm1204_vm11, %v1529_v28 }
0x1b8e   :  { %v1622_v29 = vpop.f32.mrb[14].mxu1 }
0x1b8f   :  { %2260 = vrcp.f32 %v1622_v29  ;;  %v2033_v30 = vpop.f32.mrb[15].mxu1 }
0x1b99   :  { %v2261_v31 = vpop.eup %2260 }
0x1b9a   :  { %1629 = vperm.xlu1 %2185, %v2261_v31  }
0x1c19   :  { %v1630_v43 = vpop.permute.xlu1 %1629 }
0x1c1a   :  { %v1632_v59 = vmul.f32 %v1630_v43, %v1622_v29 }
0x1c1c   :  { %1645 = vrot.lane.b32.xlu0 %v1632_v59, %s2302_s24 }
0x1c8e   :  { %v1646_v44 = vpop.permute.xlu0 %1645 }
0x1c8f   :  { %2043 = vmatmul.mubr.msk.f32.vlgmr.msra.gmra.mrb[12].mxu0 %vm252_vm9, %v1646_v44 }
0x1d62   :  { %v1715_v47 = vpop.f32.mrb[12].mxu0 }
0x1d63   :  { %v1716_v48 = vadd.f32 %v1771_v45, %v1715_v47  ;;  %v2044_v49 = vpop.f32.mrb[13].mxu0 }
0x1d65   :  { %1720 = vst.msk [vmem:[#allocation3] sm:$0x3] %vm1719_vm10, %v1716_v48 }
0x1d66   :  { %2273 = shalt.err (!%p2270_p4)
}
0x1d67   :  { %s2274_s29 = scalar_lea.hbm %s2711_s11, 32 }
0x1d68   :  { %p2275_p5 = scmp.ne.s32.totalorder %s2711_s11, %s2274_s29  ;;  %p2278_p6 = scmp.lt.u32.totalorder %s2274_s29, %s2711_s11 }
0x1d6a   :  { %p2280_p7 = pnand %p2278_p6, %p2275_p5 }
0x1d6c   :  { %2283 = shalt.err (!%p2280_p7)
}
0x1d6d   :  { %1730 = dma.vmem_to_hbm [thread:$0]  %s1728_s5, 32, %s2711_s11, [#allocation4]  }
0x1d6e   :  { %2284 = dma.done.wait [#allocation4], 32  }
0x1d6f   :  { %2285 = vsyncadd [#allocation4], 4294967264 }
0x1d70   :  { %1734 = vsyncpa [#allocation4], 1 }

</bundles_post_ra>
